<compile_context>
chip_gen: v7x
topology: tpu7x:2x2x1
jax: 0.10.0
libtpu: 0.0.40
codegen_flags: <defaults>
</compile_context>

<pallas_src>
import math
import jax
import jax.numpy as jnp
from jax.experimental import pallas as pl
from jax.experimental.pallas import tpu as pltpu

# ----- model config (small, consistent with the module) -----
VOCAB      = 128
BLOCK_SIZE = 16
D_MODEL    = 32
N_HEAD     = 4
N_LAYER    = 2
HEAD_DIM   = D_MODEL // N_HEAD
EPS        = 1e-5
MXU_DTYPE  = jnp.bfloat16       # MXU-native on v6e/v7x; correct (if not faster) on v5e
NEG_INF    = -1e30              # applied to f32 scores only (never bf16)


# -------------------- in-kernel helpers --------------------
def _mm(a, b):
    """a @ b with bf16 operands, f32 accumulation."""
    return jnp.dot(a.astype(MXU_DTYPE), b.astype(MXU_DTYPE),
                   preferred_element_type=jnp.float32)


def _mm_nt(a, b):
    """a (M,K) @ b(N,K)^T -> (M,N); MXU consumes the transposed rhs natively."""
    return jax.lax.dot_general(a.astype(MXU_DTYPE), b.astype(MXU_DTYPE),
                               dimension_numbers=(((1,), (1,)), ((), ())),
                               preferred_element_type=jnp.float32)


def _layernorm(x, w, b):
    mu = jnp.mean(x, axis=-1, keepdims=True)
    xc = x - mu
    var = jnp.mean(xc * xc, axis=-1, keepdims=True)
    return xc * jax.lax.rsqrt(var + EPS) * w + b


def _gelu_tanh(x):
    # TODO(synk): MLP class body not given; tanh-approximate GELU assumed.
    c = math.sqrt(2.0 / math.pi)
    return 0.5 * x * (1.0 + jnp.tanh(c * (x + 0.044715 * x * x * x)))


def _softmax_rows(s):
    s = s - jnp.max(s, axis=-1, keepdims=True)
    p = jnp.exp(s)
    return p * pl.reciprocal(jnp.sum(p, axis=-1, keepdims=True), approx=True)


# -------------------- fused Pallas kernel --------------------
def kittylm_kernel(*refs):
    """Full KittyLM forward for all B*T rows in one invocation.

    refs = (ids, tok_emb, pos, mask_bias,
            [ln1w, ln1b, qkvw, qkvb, aprojw, aprojb,
             ln2w, ln2b, fcw,  fcb,  mprojw, mprojb] * N_LAYER,
            lnf_w, lnf_b, out)
    """
    ids_ref, tok_ref, pos_ref, bias_ref = refs[:4]
    layer_refs = refs[4:4 + 12 * N_LAYER]
    lnfw_ref = refs[4 + 12 * N_LAYER]
    lnfb_ref = refs[5 + 12 * N_LAYER]
    out_ref = refs[-1]

    R = out_ref.shape[0]                 # B*T flattened rows
    D = D_MODEL
    scale = 1.0 / math.sqrt(HEAD_DIM)

    tok = tok_ref[...]                                       # (V, D), tied lm_head weight
    # ---- embedding lookup as one-hot matmul (no gather) ----
    ids = ids_ref[...]                                       # (R, 1) int32
    col = jax.lax.broadcasted_iota(jnp.int32, (R, VOCAB), 1)
    onehot = (col == ids).astype(jnp.float32)                # (R, V)
    x = _mm(onehot, tok) + pos_ref[...]                      # (R, D)
    # dropout p = 0.0 -> identity

    mask_bias = bias_ref[...]                                # (R, R): 0 or NEG_INF (f32)

    for l in range(N_LAYER):
        (ln1w, ln1b, qkvw, qkvb, aprojw, aprojb,
         ln2w, ln2b, fcw, fcb, mprojw, mprojb) = layer_refs[12 * l:12 * (l + 1)]

        # pre-LN
        h = _layernorm(x, ln1w[...], ln1b[...])

        # causal multi-head self-attention (block-diagonal over flattened batch)
        qkv = _mm(h, qkvw[...]) + qkvb[...]                  # (R, 3D) f32
        wproj = aprojw[...]                                  # (D, D)
        attn = jnp.zeros((R, D), jnp.float32)
        for hd in range(N_HEAD):
            lo = hd * HEAD_DIM
            qh = qkv[:, lo:lo + HEAD_DIM]
            kh = qkv[:, D + lo:D + lo + HEAD_DIM]
            vh = qkv[:, 2 * D + lo:2 * D + lo + HEAD_DIM]
            s = _mm_nt(qh, kh) * scale + mask_bias           # f32 scores
            p = _softmax_rows(s)
            ctx = _mm(p, vh)                                 # (R, HEAD_DIM)
            # accumulate output projection per head (no lane-axis concat)
            attn = attn + _mm(ctx, wproj[lo:lo + HEAD_DIM, :])
        attn = attn + aprojb[...]

        # post-LN
        h2 = _layernorm(attn, ln2w[...], ln2b[...])

        # MLP  (NOTE: no residual adds -- faithful to KittyLMBlock.forward)
        ff = _gelu_tanh(_mm(h2, fcw[...]) + fcb[...])
        x = _mm(ff, mprojw[...]) + mprojb[...]

    # final LN + tied lm_head (trans-B contraction against tok_emb, no transpose op)
    h = _layernorm(x, lnfw_ref[...], lnfb_ref[...])
    out_ref[...] = _mm_nt(h, tok)                            # (R, V), lane-dense V=128


# -------------------- pallas_call wrapper --------------------
def kittylm_forward(input_ids, tok_emb, pos_emb, blocks, lnf_w, lnf_b):
    B, T = input_ids.shape
    assert T <= BLOCK_SIZE, "Sequence length cannot be greater than model capacity"
    R = B * T

    # glue (tiny, host/XLA side): flatten ids, tile positions, build additive mask
    ids = input_ids.reshape(R, 1).astype(jnp.int32)
    pos = jnp.tile(pos_emb[:T].astype(jnp.float32), (B, 1))          # (R, D)
    r = jnp.arange(R)
    same_b = (r[:, None] // T) == (r[None, :] // T)
    causal = (r[None, :] % T) <= (r[:, None] % T)
    mask_bias = jnp.where(same_b & causal, 0.0, NEG_INF).astype(jnp.float32)

    args = [ids, tok_emb, pos, mask_bias]
    for p in blocks:
        args.extend(p)
    args.extend([lnf_w, lnf_b])

    vmem = pl.BlockSpec(memory_space=pltpu.MemorySpace.VMEM)
    logits = pl.pallas_call(
        kittylm_kernel,
        out_shape=jax.ShapeDtypeStruct((R, VOCAB), jnp.float32),
        in_specs=[vmem] * len(args),
        out_specs=vmem,
    )(*args)
    return logits.reshape(B, T, VOCAB)


# -------------------- parameter init (deterministic, matches _init_weights) --------------------
def init_params(key):
    std = 0.2
    proj_std = 0.2 / math.sqrt(2 * N_LAYER)   # special-cased `projection.weight` init
    keys = jax.random.split(key, 2 + N_LAYER)
    # matmul weights stored bf16 (halves weight DMA, MXU-native); LN/bias params f32
    tok_emb = (jax.random.normal(keys[0], (VOCAB, D_MODEL), jnp.float32) * std).astype(MXU_DTYPE)
    pos_emb = jax.random.normal(keys[1], (BLOCK_SIZE, D_MODEL), jnp.float32) * std
    blocks = []
    for l in range(N_LAYER):
        k = jax.random.split(keys[2 + l], 4)
        blocks.append([
            jnp.ones((1, D_MODEL), jnp.float32),                                   # ln1_w
            jnp.zeros((1, D_MODEL), jnp.float32),                                  # ln1_b
            (jax.random.normal(k[0], (D_MODEL, 3 * D_MODEL), jnp.float32) * std
             ).astype(MXU_DTYPE),                                                  # qkv_w
            jnp.zeros((1, 3 * D_MODEL), jnp.float32),                              # qkv_b
            (jax.random.normal(k[1], (D_MODEL, D_MODEL), jnp.float32) * proj_std
             ).astype(MXU_DTYPE),                                                  # attn projection_w
            jnp.zeros((1, D_MODEL), jnp.float32),                                  # attn projection_b
            jnp.ones((1, D_MODEL), jnp.float32),                                   # ln2_w
            jnp.zeros((1, D_MODEL), jnp.float32),                                  # ln2_b
            (jax.random.normal(k[2], (D_MODEL, 4 * D_MODEL), jnp.float32) * std
             ).astype(MXU_DTYPE),                                                  # fc_w
            jnp.zeros((1, 4 * D_MODEL), jnp.float32),                              # fc_b
            (jax.random.normal(k[3], (4 * D_MODEL, D_MODEL), jnp.float32) * proj_std
             ).astype(MXU_DTYPE),                                                  # mlp projection_w
            jnp.zeros((1, D_MODEL), jnp.float32),                                  # mlp projection_b
        ])
    lnf_w = jnp.ones((1, D_MODEL), jnp.float32)
    lnf_b = jnp.zeros((1, D_MODEL), jnp.float32)
    return tok_emb, pos_emb, blocks, lnf_w, lnf_b


if __name__ == "__main__":
    key = jax.random.PRNGKey(0)
    pkey, dkey = jax.random.split(key)
    tok_emb, pos_emb, blocks, lnf_w, lnf_b = init_params(pkey)

    B, T = 2, 8
    input_ids = jax.random.randint(dkey, (B, T), 0, VOCAB, dtype=jnp.int32)

    logits = kittylm_forward(input_ids, tok_emb, pos_emb, blocks, lnf_w, lnf_b)
    jax.block_until_ready(logits)
    assert logits.shape == (B, T, VOCAB)
    assert bool(jnp.all(jnp.isfinite(logits)))
    print("KERNEL_OK")
</pallas_src>

<mosaic_0001>
module attributes {stable_mosaic.version = 11 : i64} {
  func.func @kittylm_kernel(%arg0: memref<16x1xi32, #tpu.memory_space<vmem>>, %arg1: memref<128x32xbf16, #tpu.memory_space<vmem>>, %arg2: memref<16x32xf32, #tpu.memory_space<vmem>>, %arg3: memref<16x16xf32, #tpu.memory_space<vmem>>, %arg4: memref<1x32xf32, #tpu.memory_space<vmem>>, %arg5: memref<1x32xf32, #tpu.memory_space<vmem>>, %arg6: memref<32x96xbf16, #tpu.memory_space<vmem>>, %arg7: memref<1x96xf32, #tpu.memory_space<vmem>>, %arg8: memref<32x32xbf16, #tpu.memory_space<vmem>>, %arg9: memref<1x32xf32, #tpu.memory_space<vmem>>, %arg10: memref<1x32xf32, #tpu.memory_space<vmem>>, %arg11: memref<1x32xf32, #tpu.memory_space<vmem>>, %arg12: memref<32x128xbf16, #tpu.memory_space<vmem>>, %arg13: memref<1x128xf32, #tpu.memory_space<vmem>>, %arg14: memref<128x32xbf16, #tpu.memory_space<vmem>>, %arg15: memref<1x32xf32, #tpu.memory_space<vmem>>, %arg16: memref<1x32xf32, #tpu.memory_space<vmem>>, %arg17: memref<1x32xf32, #tpu.memory_space<vmem>>, %arg18: memref<32x96xbf16, #tpu.memory_space<vmem>>, %arg19: memref<1x96xf32, #tpu.memory_space<vmem>>, %arg20: memref<32x32xbf16, #tpu.memory_space<vmem>>, %arg21: memref<1x32xf32, #tpu.memory_space<vmem>>, %arg22: memref<1x32xf32, #tpu.memory_space<vmem>>, %arg23: memref<1x32xf32, #tpu.memory_space<vmem>>, %arg24: memref<32x128xbf16, #tpu.memory_space<vmem>>, %arg25: memref<1x128xf32, #tpu.memory_space<vmem>>, %arg26: memref<128x32xbf16, #tpu.memory_space<vmem>>, %arg27: memref<1x32xf32, #tpu.memory_space<vmem>>, %arg28: memref<1x32xf32, #tpu.memory_space<vmem>>, %arg29: memref<1x32xf32, #tpu.memory_space<vmem>>, %arg30: memref<16x128xf32, #tpu.memory_space<vmem>>) attributes {dimension_semantics = [], scalar_prefetch = 0 : i64, scratch_operands = 0 : i64, tpu.core_type = #tpu.core_type<tc>} {
    %c0 = arith.constant 0 : index
    %c0_0 = arith.constant 0 : index
    %0 = vector.load %arg1[%c0, %c0_0] : memref<128x32xbf16, #tpu.memory_space<vmem>>, vector<128x32xbf16>
    %c0_1 = arith.constant 0 : index
    %c0_2 = arith.constant 0 : index
    %1 = vector.load %arg0[%c0_1, %c0_2] : memref<16x1xi32, #tpu.memory_space<vmem>>, vector<16x1xi32>
    %2 = tpu.iota {dimensions = array<i32: 1>} : vector<16x128xi32>
    %3 = vector.broadcast %1 : vector<16x1xi32> to vector<16x128xi32>
    %4 = arith.cmpi eq, %2, %3 : vector<16x128xi32>
    %5 = arith.extui %4 : vector<16x128xi1> to vector<16x128xi32>
    %6 = arith.sitofp %5 : vector<16x128xi32> to vector<16x128xf32>
    %7 = arith.truncf %6 : vector<16x128xf32> to vector<16x128xbf16>
    %cst = arith.constant dense<0.000000e+00> : vector<16x32xf32>
    %8 = tpu.matmul %7, %0, %cst {dimension_numbers = #tpu.dot_dimension_numbers<[1], [0], [0], [1], [0, 0, 1, 1], [], []>} : vector<16x128xbf16>, vector<128x32xbf16>, vector<16x32xf32> -> vector<16x32xf32>
    %c0_3 = arith.constant 0 : index
    %c0_4 = arith.constant 0 : index
    %9 = vector.load %arg2[%c0_3, %c0_4] : memref<16x32xf32, #tpu.memory_space<vmem>>, vector<16x32xf32>
    %10 = arith.addf %8, %9 : vector<16x32xf32>
    %c0_5 = arith.constant 0 : index
    %c0_6 = arith.constant 0 : index
    %11 = vector.load %arg3[%c0_5, %c0_6] : memref<16x16xf32, #tpu.memory_space<vmem>>, vector<16x16xf32>
    %c0_7 = arith.constant 0 : index
    %c0_8 = arith.constant 0 : index
    %12 = vector.load %arg4[%c0_7, %c0_8] : memref<1x32xf32, #tpu.memory_space<vmem>>, vector<1x32xf32>
    %c0_9 = arith.constant 0 : index
    %c0_10 = arith.constant 0 : index
    %13 = vector.load %arg5[%c0_9, %c0_10] : memref<1x32xf32, #tpu.memory_space<vmem>>, vector<1x32xf32>
    %cst_11 = arith.constant dense<0.000000e+00> : vector<16xf32>
    %14 = vector.multi_reduction <add>, %10, %cst_11 [1] : vector<16x32xf32> to vector<16xf32>
    %15 = vector.shape_cast %14 : vector<16xf32> to vector<16x1xf32>
    %cst_12 = arith.constant 3.200000e+01 : f32
    %16 = vector.broadcast %cst_12 : f32 to vector<16x1xf32>
    %17 = arith.divf %15, %16 : vector<16x1xf32>
    %18 = vector.broadcast %17 : vector<16x1xf32> to vector<16x32xf32>
    %19 = arith.subf %10, %18 : vector<16x32xf32>
    %20 = arith.mulf %19, %19 : vector<16x32xf32>
    %cst_13 = arith.constant dense<0.000000e+00> : vector<16xf32>
    %21 = vector.multi_reduction <add>, %20, %cst_13 [1] : vector<16x32xf32> to vector<16xf32>
    %22 = vector.shape_cast %21 : vector<16xf32> to vector<16x1xf32>
    %cst_14 = arith.constant 3.200000e+01 : f32
    %23 = vector.broadcast %cst_14 : f32 to vector<16x1xf32>
    %24 = arith.divf %22, %23 : vector<16x1xf32>
    %cst_15 = arith.constant 9.99999974E-6 : f32
    %25 = vector.broadcast %cst_15 : f32 to vector<16x1xf32>
    %26 = arith.addf %24, %25 : vector<16x1xf32>
    %27 = math.rsqrt %26 : vector<16x1xf32>
    %28 = vector.broadcast %27 : vector<16x1xf32> to vector<16x32xf32>
    %29 = arith.mulf %19, %28 : vector<16x32xf32>
    %30 = vector.broadcast %12 : vector<1x32xf32> to vector<16x32xf32>
    %31 = arith.mulf %29, %30 : vector<16x32xf32>
    %32 = vector.broadcast %13 : vector<1x32xf32> to vector<16x32xf32>
    %33 = arith.addf %31, %32 : vector<16x32xf32>
    %c0_16 = arith.constant 0 : index
    %c0_17 = arith.constant 0 : index
    %34 = vector.load %arg6[%c0_16, %c0_17] : memref<32x96xbf16, #tpu.memory_space<vmem>>, vector<32x96xbf16>
    %35 = arith.truncf %33 : vector<16x32xf32> to vector<16x32xbf16>
    %cst_18 = arith.constant dense<0.000000e+00> : vector<16x96xf32>
    %36 = tpu.matmul %35, %34, %cst_18 {dimension_numbers = #tpu.dot_dimension_numbers<[1], [0], [0], [1], [0, 0, 1, 1], [], []>} : vector<16x32xbf16>, vector<32x96xbf16>, vector<16x96xf32> -> vector<16x96xf32>
    %c0_19 = arith.constant 0 : index
    %c0_20 = arith.constant 0 : index
    %37 = vector.load %arg7[%c0_19, %c0_20] : memref<1x96xf32, #tpu.memory_space<vmem>>, vector<1x96xf32>
    %38 = vector.broadcast %37 : vector<1x96xf32> to vector<16x96xf32>
    %39 = arith.addf %36, %38 : vector<16x96xf32>
    %c0_21 = arith.constant 0 : index
    %c0_22 = arith.constant 0 : index
    %40 = vector.load %arg8[%c0_21, %c0_22] : memref<32x32xbf16, #tpu.memory_space<vmem>>, vector<32x32xbf16>
    %cst_23 = arith.constant 0.000000e+00 : f32
    %41 = vector.broadcast %cst_23 : f32 to vector<16x32xf32>
    %42 = vector.extract_strided_slice %39 {offsets = [0, 0], sizes = [16, 8], strides = [1, 1]} : vector<16x96xf32> to vector<16x8xf32>
    %43 = vector.extract_strided_slice %39 {offsets = [0, 32], sizes = [16, 8], strides = [1, 1]} : vector<16x96xf32> to vector<16x8xf32>
    %44 = vector.extract_strided_slice %39 {offsets = [0, 64], sizes = [16, 8], strides = [1, 1]} : vector<16x96xf32> to vector<16x8xf32>
    %45 = arith.truncf %42 : vector<16x8xf32> to vector<16x8xbf16>
    %46 = arith.truncf %43 : vector<16x8xf32> to vector<16x8xbf16>
    %cst_24 = arith.constant dense<0.000000e+00> : vector<16x16xf32>
    %47 = tpu.matmul %45, %46, %cst_24 {dimension_numbers = #tpu.dot_dimension_numbers<[1], [1], [0], [0], [0, 0, 1, 0], [], []>} : vector<16x8xbf16>, vector<16x8xbf16>, vector<16x16xf32> -> vector<16x16xf32>
    %cst_25 = arith.constant 0.353553385 : f32
    %48 = vector.broadcast %cst_25 : f32 to vector<16x16xf32>
    %49 = arith.mulf %47, %48 : vector<16x16xf32>
    %50 = arith.addf %49, %11 : vector<16x16xf32>
    %cst_26 = arith.constant dense<0xFF800000> : vector<16xf32>
    %51 = vector.multi_reduction <maximumf>, %50, %cst_26 [1] : vector<16x16xf32> to vector<16xf32>
    %52 = vector.shape_cast %51 : vector<16xf32> to vector<16x1xf32>
    %53 = vector.broadcast %52 : vector<16x1xf32> to vector<16x16xf32>
    %54 = arith.subf %50, %53 : vector<16x16xf32>
    %55 = math.exp %54 : vector<16x16xf32>
    %cst_27 = arith.constant dense<0.000000e+00> : vector<16xf32>
    %56 = vector.multi_reduction <add>, %55, %cst_27 [1] : vector<16x16xf32> to vector<16xf32>
    %57 = vector.shape_cast %56 : vector<16xf32> to vector<16x1xf32>
    %58 = tpu.reciprocal %57 {approx = true} : vector<16x1xf32> -> vector<16x1xf32>
    %59 = vector.broadcast %58 : vector<16x1xf32> to vector<16x16xf32>
    %60 = arith.mulf %55, %59 : vector<16x16xf32>
    %61 = arith.truncf %60 : vector<16x16xf32> to vector<16x16xbf16>
    %62 = arith.truncf %44 : vector<16x8xf32> to vector<16x8xbf16>
    %cst_28 = arith.constant dense<0.000000e+00> : vector<16x8xf32>
    %63 = tpu.matmul %61, %62, %cst_28 {dimension_numbers = #tpu.dot_dimension_numbers<[1], [0], [0], [1], [0, 0, 1, 1], [], []>} : vector<16x16xbf16>, vector<16x8xbf16>, vector<16x8xf32> -> vector<16x8xf32>
    %64 = vector.extract_strided_slice %40 {offsets = [0, 0], sizes = [8, 32], strides = [1, 1]} : vector<32x32xbf16> to vector<8x32xbf16>
    %65 = arith.truncf %63 : vector<16x8xf32> to vector<16x8xbf16>
    %cst_29 = arith.constant dense<0.000000e+00> : vector<16x32xf32>
    %66 = tpu.matmul %65, %64, %cst_29 {dimension_numbers = #tpu.dot_dimension_numbers<[1], [0], [0], [1], [0, 0, 1, 1], [], []>} : vector<16x8xbf16>, vector<8x32xbf16>, vector<16x32xf32> -> vector<16x32xf32>
    %67 = arith.addf %41, %66 : vector<16x32xf32>
    %68 = vector.extract_strided_slice %39 {offsets = [0, 8], sizes = [16, 8], strides = [1, 1]} : vector<16x96xf32> to vector<16x8xf32>
    %69 = vector.extract_strided_slice %39 {offsets = [0, 40], sizes = [16, 8], strides = [1, 1]} : vector<16x96xf32> to vector<16x8xf32>
    %70 = vector.extract_strided_slice %39 {offsets = [0, 72], sizes = [16, 8], strides = [1, 1]} : vector<16x96xf32> to vector<16x8xf32>
    %71 = arith.truncf %68 : vector<16x8xf32> to vector<16x8xbf16>
    %72 = arith.truncf %69 : vector<16x8xf32> to vector<16x8xbf16>
    %cst_30 = arith.constant dense<0.000000e+00> : vector<16x16xf32>
    %73 = tpu.matmul %71, %72, %cst_30 {dimension_numbers = #tpu.dot_dimension_numbers<[1], [1], [0], [0], [0, 0, 1, 0], [], []>} : vector<16x8xbf16>, vector<16x8xbf16>, vector<16x16xf32> -> vector<16x16xf32>
    %cst_31 = arith.constant 0.353553385 : f32
    %74 = vector.broadcast %cst_31 : f32 to vector<16x16xf32>
    %75 = arith.mulf %73, %74 : vector<16x16xf32>
    %76 = arith.addf %75, %11 : vector<16x16xf32>
    %cst_32 = arith.constant dense<0xFF800000> : vector<16xf32>
    %77 = vector.multi_reduction <maximumf>, %76, %cst_32 [1] : vector<16x16xf32> to vector<16xf32>
    %78 = vector.shape_cast %77 : vector<16xf32> to vector<16x1xf32>
    %79 = vector.broadcast %78 : vector<16x1xf32> to vector<16x16xf32>
    %80 = arith.subf %76, %79 : vector<16x16xf32>
    %81 = math.exp %80 : vector<16x16xf32>
    %cst_33 = arith.constant dense<0.000000e+00> : vector<16xf32>
    %82 = vector.multi_reduction <add>, %81, %cst_33 [1] : vector<16x16xf32> to vector<16xf32>
    %83 = vector.shape_cast %82 : vector<16xf32> to vector<16x1xf32>
    %84 = tpu.reciprocal %83 {approx = true} : vector<16x1xf32> -> vector<16x1xf32>
    %85 = vector.broadcast %84 : vector<16x1xf32> to vector<16x16xf32>
    %86 = arith.mulf %81, %85 : vector<16x16xf32>
    %87 = arith.truncf %86 : vector<16x16xf32> to vector<16x16xbf16>
    %88 = arith.truncf %70 : vector<16x8xf32> to vector<16x8xbf16>
    %cst_34 = arith.constant dense<0.000000e+00> : vector<16x8xf32>
    %89 = tpu.matmul %87, %88, %cst_34 {dimension_numbers = #tpu.dot_dimension_numbers<[1], [0], [0], [1], [0, 0, 1, 1], [], []>} : vector<16x16xbf16>, vector<16x8xbf16>, vector<16x8xf32> -> vector<16x8xf32>
    %90 = vector.extract_strided_slice %40 {offsets = [8, 0], sizes = [8, 32], strides = [1, 1]} : vector<32x32xbf16> to vector<8x32xbf16>
    %91 = arith.truncf %89 : vector<16x8xf32> to vector<16x8xbf16>
    %cst_35 = arith.constant dense<0.000000e+00> : vector<16x32xf32>
    %92 = tpu.matmul %91, %90, %cst_35 {dimension_numbers = #tpu.dot_dimension_numbers<[1], [0], [0], [1], [0, 0, 1, 1], [], []>} : vector<16x8xbf16>, vector<8x32xbf16>, vector<16x32xf32> -> vector<16x32xf32>
    %93 = arith.addf %67, %92 : vector<16x32xf32>
    %94 = vector.extract_strided_slice %39 {offsets = [0, 16], sizes = [16, 8], strides = [1, 1]} : vector<16x96xf32> to vector<16x8xf32>
    %95 = vector.extract_strided_slice %39 {offsets = [0, 48], sizes = [16, 8], strides = [1, 1]} : vector<16x96xf32> to vector<16x8xf32>
    %96 = vector.extract_strided_slice %39 {offsets = [0, 80], sizes = [16, 8], strides = [1, 1]} : vector<16x96xf32> to vector<16x8xf32>
    %97 = arith.truncf %94 : vector<16x8xf32> to vector<16x8xbf16>
    %98 = arith.truncf %95 : vector<16x8xf32> to vector<16x8xbf16>
    %cst_36 = arith.constant dense<0.000000e+00> : vector<16x16xf32>
    %99 = tpu.matmul %97, %98, %cst_36 {dimension_numbers = #tpu.dot_dimension_numbers<[1], [1], [0], [0], [0, 0, 1, 0], [], []>} : vector<16x8xbf16>, vector<16x8xbf16>, vector<16x16xf32> -> vector<16x16xf32>
    %cst_37 = arith.constant 0.353553385 : f32
    %100 = vector.broadcast %cst_37 : f32 to vector<16x16xf32>
    %101 = arith.mulf %99, %100 : vector<16x16xf32>
    %102 = arith.addf %101, %11 : vector<16x16xf32>
    %cst_38 = arith.constant dense<0xFF800000> : vector<16xf32>
    %103 = vector.multi_reduction <maximumf>, %102, %cst_38 [1] : vector<16x16xf32> to vector<16xf32>
    %104 = vector.shape_cast %103 : vector<16xf32> to vector<16x1xf32>
    %105 = vector.broadcast %104 : vector<16x1xf32> to vector<16x16xf32>
    %106 = arith.subf %102, %105 : vector<16x16xf32>
    %107 = math.exp %106 : vector<16x16xf32>
    %cst_39 = arith.constant dense<0.000000e+00> : vector<16xf32>
    %108 = vector.multi_reduction <add>, %107, %cst_39 [1] : vector<16x16xf32> to vector<16xf32>
    %109 = vector.shape_cast %108 : vector<16xf32> to vector<16x1xf32>
    %110 = tpu.reciprocal %109 {approx = true} : vector<16x1xf32> -> vector<16x1xf32>
    %111 = vector.broadcast %110 : vector<16x1xf32> to vector<16x16xf32>
    %112 = arith.mulf %107, %111 : vector<16x16xf32>
    %113 = arith.truncf %112 : vector<16x16xf32> to vector<16x16xbf16>
    %114 = arith.truncf %96 : vector<16x8xf32> to vector<16x8xbf16>
    %cst_40 = arith.constant dense<0.000000e+00> : vector<16x8xf32>
    %115 = tpu.matmul %113, %114, %cst_40 {dimension_numbers = #tpu.dot_dimension_numbers<[1], [0], [0], [1], [0, 0, 1, 1], [], []>} : vector<16x16xbf16>, vector<16x8xbf16>, vector<16x8xf32> -> vector<16x8xf32>
    %116 = vector.extract_strided_slice %40 {offsets = [16, 0], sizes = [8, 32], strides = [1, 1]} : vector<32x32xbf16> to vector<8x32xbf16>
    %117 = arith.truncf %115 : vector<16x8xf32> to vector<16x8xbf16>
    %cst_41 = arith.constant dense<0.000000e+00> : vector<16x32xf32>
    %118 = tpu.matmul %117, %116, %cst_41 {dimension_numbers = #tpu.dot_dimension_numbers<[1], [0], [0], [1], [0, 0, 1, 1], [], []>} : vector<16x8xbf16>, vector<8x32xbf16>, vector<16x32xf32> -> vector<16x32xf32>
    %119 = arith.addf %93, %118 : vector<16x32xf32>
    %120 = vector.extract_strided_slice %39 {offsets = [0, 24], sizes = [16, 8], strides = [1, 1]} : vector<16x96xf32> to vector<16x8xf32>
    %121 = vector.extract_strided_slice %39 {offsets = [0, 56], sizes = [16, 8], strides = [1, 1]} : vector<16x96xf32> to vector<16x8xf32>
    %122 = vector.extract_strided_slice %39 {offsets = [0, 88], sizes = [16, 8], strides = [1, 1]} : vector<16x96xf32> to vector<16x8xf32>
    %123 = arith.truncf %120 : vector<16x8xf32> to vector<16x8xbf16>
    %124 = arith.truncf %121 : vector<16x8xf32> to vector<16x8xbf16>
    %cst_42 = arith.constant dense<0.000000e+00> : vector<16x16xf32>
    %125 = tpu.matmul %123, %124, %cst_42 {dimension_numbers = #tpu.dot_dimension_numbers<[1], [1], [0], [0], [0, 0, 1, 0], [], []>} : vector<16x8xbf16>, vector<16x8xbf16>, vector<16x16xf32> -> vector<16x16xf32>
    %cst_43 = arith.constant 0.353553385 : f32
    %126 = vector.broadcast %cst_43 : f32 to vector<16x16xf32>
    %127 = arith.mulf %125, %126 : vector<16x16xf32>
    %128 = arith.addf %127, %11 : vector<16x16xf32>
    %cst_44 = arith.constant dense<0xFF800000> : vector<16xf32>
    %129 = vector.multi_reduction <maximumf>, %128, %cst_44 [1] : vector<16x16xf32> to vector<16xf32>
    %130 = vector.shape_cast %129 : vector<16xf32> to vector<16x1xf32>
    %131 = vector.broadcast %130 : vector<16x1xf32> to vector<16x16xf32>
    %132 = arith.subf %128, %131 : vector<16x16xf32>
    %133 = math.exp %132 : vector<16x16xf32>
    %cst_45 = arith.constant dense<0.000000e+00> : vector<16xf32>
    %134 = vector.multi_reduction <add>, %133, %cst_45 [1] : vector<16x16xf32> to vector<16xf32>
    %135 = vector.shape_cast %134 : vector<16xf32> to vector<16x1xf32>
    %136 = tpu.reciprocal %135 {approx = true} : vector<16x1xf32> -> vector<16x1xf32>
    %137 = vector.broadcast %136 : vector<16x1xf32> to vector<16x16xf32>
    %138 = arith.mulf %133, %137 : vector<16x16xf32>
    %139 = arith.truncf %138 : vector<16x16xf32> to vector<16x16xbf16>
    %140 = arith.truncf %122 : vector<16x8xf32> to vector<16x8xbf16>
    %cst_46 = arith.constant dense<0.000000e+00> : vector<16x8xf32>
    %141 = tpu.matmul %139, %140, %cst_46 {dimension_numbers = #tpu.dot_dimension_numbers<[1], [0], [0], [1], [0, 0, 1, 1], [], []>} : vector<16x16xbf16>, vector<16x8xbf16>, vector<16x8xf32> -> vector<16x8xf32>
    %142 = vector.extract_strided_slice %40 {offsets = [24, 0], sizes = [8, 32], strides = [1, 1]} : vector<32x32xbf16> to vector<8x32xbf16>
    %143 = arith.truncf %141 : vector<16x8xf32> to vector<16x8xbf16>
    %cst_47 = arith.constant dense<0.000000e+00> : vector<16x32xf32>
    %144 = tpu.matmul %143, %142, %cst_47 {dimension_numbers = #tpu.dot_dimension_numbers<[1], [0], [0], [1], [0, 0, 1, 1], [], []>} : vector<16x8xbf16>, vector<8x32xbf16>, vector<16x32xf32> -> vector<16x32xf32>
    %145 = arith.addf %119, %144 : vector<16x32xf32>
    %c0_48 = arith.constant 0 : index
    %c0_49 = arith.constant 0 : index
    %146 = vector.load %arg9[%c0_48, %c0_49] : memref<1x32xf32, #tpu.memory_space<vmem>>, vector<1x32xf32>
    %147 = vector.broadcast %146 : vector<1x32xf32> to vector<16x32xf32>
    %148 = arith.addf %145, %147 : vector<16x32xf32>
    %c0_50 = arith.constant 0 : index
    %c0_51 = arith.constant 0 : index
    %149 = vector.load %arg10[%c0_50, %c0_51] : memref<1x32xf32, #tpu.memory_space<vmem>>, vector<1x32xf32>
    %c0_52 = arith.constant 0 : index
    %c0_53 = arith.constant 0 : index
    %150 = vector.load %arg11[%c0_52, %c0_53] : memref<1x32xf32, #tpu.memory_space<vmem>>, vector<1x32xf32>
    %cst_54 = arith.constant dense<0.000000e+00> : vector<16xf32>
    %151 = vector.multi_reduction <add>, %148, %cst_54 [1] : vector<16x32xf32> to vector<16xf32>
    %152 = vector.shape_cast %151 : vector<16xf32> to vector<16x1xf32>
    %cst_55 = arith.constant 3.200000e+01 : f32
    %153 = vector.broadcast %cst_55 : f32 to vector<16x1xf32>
    %154 = arith.divf %152, %153 : vector<16x1xf32>
    %155 = vector.broadcast %154 : vector<16x1xf32> to vector<16x32xf32>
    %156 = arith.subf %148, %155 : vector<16x32xf32>
    %157 = arith.mulf %156, %156 : vector<16x32xf32>
    %cst_56 = arith.constant dense<0.000000e+00> : vector<16xf32>
    %158 = vector.multi_reduction <add>, %157, %cst_56 [1] : vector<16x32xf32> to vector<16xf32>
    %159 = vector.shape_cast %158 : vector<16xf32> to vector<16x1xf32>
    %cst_57 = arith.constant 3.200000e+01 : f32
    %160 = vector.broadcast %cst_57 : f32 to vector<16x1xf32>
    %161 = arith.divf %159, %160 : vector<16x1xf32>
    %cst_58 = arith.constant 9.99999974E-6 : f32
    %162 = vector.broadcast %cst_58 : f32 to vector<16x1xf32>
    %163 = arith.addf %161, %162 : vector<16x1xf32>
    %164 = math.rsqrt %163 : vector<16x1xf32>
    %165 = vector.broadcast %164 : vector<16x1xf32> to vector<16x32xf32>
    %166 = arith.mulf %156, %165 : vector<16x32xf32>
    %167 = vector.broadcast %149 : vector<1x32xf32> to vector<16x32xf32>
    %168 = arith.mulf %166, %167 : vector<16x32xf32>
    %169 = vector.broadcast %150 : vector<1x32xf32> to vector<16x32xf32>
    %170 = arith.addf %168, %169 : vector<16x32xf32>
    %c0_59 = arith.constant 0 : index
    %c0_60 = arith.constant 0 : index
    %171 = vector.load %arg12[%c0_59, %c0_60] : memref<32x128xbf16, #tpu.memory_space<vmem>>, vector<32x128xbf16>
    %172 = arith.truncf %170 : vector<16x32xf32> to vector<16x32xbf16>
    %cst_61 = arith.constant dense<0.000000e+00> : vector<16x128xf32>
    %173 = tpu.matmul %172, %171, %cst_61 {dimension_numbers = #tpu.dot_dimension_numbers<[1], [0], [0], [1], [0, 0, 1, 1], [], []>} : vector<16x32xbf16>, vector<32x128xbf16>, vector<16x128xf32> -> vector<16x128xf32>
    %c0_62 = arith.constant 0 : index
    %c0_63 = arith.constant 0 : index
    %174 = vector.load %arg13[%c0_62, %c0_63] : memref<1x128xf32, #tpu.memory_space<vmem>>, vector<1x128xf32>
    %175 = vector.broadcast %174 : vector<1x128xf32> to vector<16x128xf32>
    %176 = arith.addf %173, %175 : vector<16x128xf32>
    %cst_64 = arith.constant 5.000000e-01 : f32
    %177 = vector.broadcast %cst_64 : f32 to vector<16x128xf32>
    %178 = arith.mulf %177, %176 : vector<16x128xf32>
    %cst_65 = arith.constant 4.471500e-02 : f32
    %179 = vector.broadcast %cst_65 : f32 to vector<16x128xf32>
    %180 = arith.mulf %179, %176 : vector<16x128xf32>
    %181 = arith.mulf %180, %176 : vector<16x128xf32>
    %182 = arith.mulf %181, %176 : vector<16x128xf32>
    %183 = arith.addf %176, %182 : vector<16x128xf32>
    %cst_66 = arith.constant 0.797884583 : f32
    %184 = vector.broadcast %cst_66 : f32 to vector<16x128xf32>
    %185 = arith.mulf %184, %183 : vector<16x128xf32>
    %186 = math.tanh %185 : vector<16x128xf32>
    %cst_67 = arith.constant 1.000000e+00 : f32
    %187 = vector.broadcast %cst_67 : f32 to vector<16x128xf32>
    %188 = arith.addf %187, %186 : vector<16x128xf32>
    %189 = arith.mulf %178, %188 : vector<16x128xf32>
    %c0_68 = arith.constant 0 : index
    %c0_69 = arith.constant 0 : index
    %190 = vector.load %arg14[%c0_68, %c0_69] : memref<128x32xbf16, #tpu.memory_space<vmem>>, vector<128x32xbf16>
    %191 = arith.truncf %189 : vector<16x128xf32> to vector<16x128xbf16>
    %cst_70 = arith.constant dense<0.000000e+00> : vector<16x32xf32>
    %192 = tpu.matmul %191, %190, %cst_70 {dimension_numbers = #tpu.dot_dimension_numbers<[1], [0], [0], [1], [0, 0, 1, 1], [], []>} : vector<16x128xbf16>, vector<128x32xbf16>, vector<16x32xf32> -> vector<16x32xf32>
    %c0_71 = arith.constant 0 : index
    %c0_72 = arith.constant 0 : index
    %193 = vector.load %arg15[%c0_71, %c0_72] : memref<1x32xf32, #tpu.memory_space<vmem>>, vector<1x32xf32>
    %194 = vector.broadcast %193 : vector<1x32xf32> to vector<16x32xf32>
    %195 = arith.addf %192, %194 : vector<16x32xf32>
    %c0_73 = arith.constant 0 : index
    %c0_74 = arith.constant 0 : index
    %196 = vector.load %arg16[%c0_73, %c0_74] : memref<1x32xf32, #tpu.memory_space<vmem>>, vector<1x32xf32>
    %c0_75 = arith.constant 0 : index
    %c0_76 = arith.constant 0 : index
    %197 = vector.load %arg17[%c0_75, %c0_76] : memref<1x32xf32, #tpu.memory_space<vmem>>, vector<1x32xf32>
    %cst_77 = arith.constant dense<0.000000e+00> : vector<16xf32>
    %198 = vector.multi_reduction <add>, %195, %cst_77 [1] : vector<16x32xf32> to vector<16xf32>
    %199 = vector.shape_cast %198 : vector<16xf32> to vector<16x1xf32>
    %cst_78 = arith.constant 3.200000e+01 : f32
    %200 = vector.broadcast %cst_78 : f32 to vector<16x1xf32>
    %201 = arith.divf %199, %200 : vector<16x1xf32>
    %202 = vector.broadcast %201 : vector<16x1xf32> to vector<16x32xf32>
    %203 = arith.subf %195, %202 : vector<16x32xf32>
    %204 = arith.mulf %203, %203 : vector<16x32xf32>
    %cst_79 = arith.constant dense<0.000000e+00> : vector<16xf32>
    %205 = vector.multi_reduction <add>, %204, %cst_79 [1] : vector<16x32xf32> to vector<16xf32>
    %206 = vector.shape_cast %205 : vector<16xf32> to vector<16x1xf32>
    %cst_80 = arith.constant 3.200000e+01 : f32
    %207 = vector.broadcast %cst_80 : f32 to vector<16x1xf32>
    %208 = arith.divf %206, %207 : vector<16x1xf32>
    %cst_81 = arith.constant 9.99999974E-6 : f32
    %209 = vector.broadcast %cst_81 : f32 to vector<16x1xf32>
    %210 = arith.addf %208, %209 : vector<16x1xf32>
    %211 = math.rsqrt %210 : vector<16x1xf32>
    %212 = vector.broadcast %211 : vector<16x1xf32> to vector<16x32xf32>
    %213 = arith.mulf %203, %212 : vector<16x32xf32>
    %214 = vector.broadcast %196 : vector<1x32xf32> to vector<16x32xf32>
    %215 = arith.mulf %213, %214 : vector<16x32xf32>
    %216 = vector.broadcast %197 : vector<1x32xf32> to vector<16x32xf32>
    %217 = arith.addf %215, %216 : vector<16x32xf32>
    %c0_82 = arith.constant 0 : index
    %c0_83 = arith.constant 0 : index
    %218 = vector.load %arg18[%c0_82, %c0_83] : memref<32x96xbf16, #tpu.memory_space<vmem>>, vector<32x96xbf16>
    %219 = arith.truncf %217 : vector<16x32xf32> to vector<16x32xbf16>
    %cst_84 = arith.constant dense<0.000000e+00> : vector<16x96xf32>
    %220 = tpu.matmul %219, %218, %cst_84 {dimension_numbers = #tpu.dot_dimension_numbers<[1], [0], [0], [1], [0, 0, 1, 1], [], []>} : vector<16x32xbf16>, vector<32x96xbf16>, vector<16x96xf32> -> vector<16x96xf32>
    %c0_85 = arith.constant 0 : index
    %c0_86 = arith.constant 0 : index
    %221 = vector.load %arg19[%c0_85, %c0_86] : memref<1x96xf32, #tpu.memory_space<vmem>>, vector<1x96xf32>
    %222 = vector.broadcast %221 : vector<1x96xf32> to vector<16x96xf32>
    %223 = arith.addf %220, %222 : vector<16x96xf32>
    %c0_87 = arith.constant 0 : index
    %c0_88 = arith.constant 0 : index
    %224 = vector.load %arg20[%c0_87, %c0_88] : memref<32x32xbf16, #tpu.memory_space<vmem>>, vector<32x32xbf16>
    %cst_89 = arith.constant 0.000000e+00 : f32
    %225 = vector.broadcast %cst_89 : f32 to vector<16x32xf32>
    %226 = vector.extract_strided_slice %223 {offsets = [0, 0], sizes = [16, 8], strides = [1, 1]} : vector<16x96xf32> to vector<16x8xf32>
    %227 = vector.extract_strided_slice %223 {offsets = [0, 32], sizes = [16, 8], strides = [1, 1]} : vector<16x96xf32> to vector<16x8xf32>
    %228 = vector.extract_strided_slice %223 {offsets = [0, 64], sizes = [16, 8], strides = [1, 1]} : vector<16x96xf32> to vector<16x8xf32>
    %229 = arith.truncf %226 : vector<16x8xf32> to vector<16x8xbf16>
    %230 = arith.truncf %227 : vector<16x8xf32> to vector<16x8xbf16>
    %cst_90 = arith.constant dense<0.000000e+00> : vector<16x16xf32>
    %231 = tpu.matmul %229, %230, %cst_90 {dimension_numbers = #tpu.dot_dimension_numbers<[1], [1], [0], [0], [0, 0, 1, 0], [], []>} : vector<16x8xbf16>, vector<16x8xbf16>, vector<16x16xf32> -> vector<16x16xf32>
    %cst_91 = arith.constant 0.353553385 : f32
    %232 = vector.broadcast %cst_91 : f32 to vector<16x16xf32>
    %233 = arith.mulf %231, %232 : vector<16x16xf32>
    %234 = arith.addf %233, %11 : vector<16x16xf32>
    %cst_92 = arith.constant dense<0xFF800000> : vector<16xf32>
    %235 = vector.multi_reduction <maximumf>, %234, %cst_92 [1] : vector<16x16xf32> to vector<16xf32>
    %236 = vector.shape_cast %235 : vector<16xf32> to vector<16x1xf32>
    %237 = vector.broadcast %236 : vector<16x1xf32> to vector<16x16xf32>
    %238 = arith.subf %234, %237 : vector<16x16xf32>
    %239 = math.exp %238 : vector<16x16xf32>
    %cst_93 = arith.constant dense<0.000000e+00> : vector<16xf32>
    %240 = vector.multi_reduction <add>, %239, %cst_93 [1] : vector<16x16xf32> to vector<16xf32>
    %241 = vector.shape_cast %240 : vector<16xf32> to vector<16x1xf32>
    %242 = tpu.reciprocal %241 {approx = true} : vector<16x1xf32> -> vector<16x1xf32>
    %243 = vector.broadcast %242 : vector<16x1xf32> to vector<16x16xf32>
    %244 = arith.mulf %239, %243 : vector<16x16xf32>
    %245 = arith.truncf %244 : vector<16x16xf32> to vector<16x16xbf16>
    %246 = arith.truncf %228 : vector<16x8xf32> to vector<16x8xbf16>
    %cst_94 = arith.constant dense<0.000000e+00> : vector<16x8xf32>
    %247 = tpu.matmul %245, %246, %cst_94 {dimension_numbers = #tpu.dot_dimension_numbers<[1], [0], [0], [1], [0, 0, 1, 1], [], []>} : vector<16x16xbf16>, vector<16x8xbf16>, vector<16x8xf32> -> vector<16x8xf32>
    %248 = vector.extract_strided_slice %224 {offsets = [0, 0], sizes = [8, 32], strides = [1, 1]} : vector<32x32xbf16> to vector<8x32xbf16>
    %249 = arith.truncf %247 : vector<16x8xf32> to vector<16x8xbf16>
    %cst_95 = arith.constant dense<0.000000e+00> : vector<16x32xf32>
    %250 = tpu.matmul %249, %248, %cst_95 {dimension_numbers = #tpu.dot_dimension_numbers<[1], [0], [0], [1], [0, 0, 1, 1], [], []>} : vector<16x8xbf16>, vector<8x32xbf16>, vector<16x32xf32> -> vector<16x32xf32>
    %251 = arith.addf %225, %250 : vector<16x32xf32>
    %252 = vector.extract_strided_slice %223 {offsets = [0, 8], sizes = [16, 8], strides = [1, 1]} : vector<16x96xf32> to vector<16x8xf32>
    %253 = vector.extract_strided_slice %223 {offsets = [0, 40], sizes = [16, 8], strides = [1, 1]} : vector<16x96xf32> to vector<16x8xf32>
    %254 = vector.extract_strided_slice %223 {offsets = [0, 72], sizes = [16, 8], strides = [1, 1]} : vector<16x96xf32> to vector<16x8xf32>
    %255 = arith.truncf %252 : vector<16x8xf32> to vector<16x8xbf16>
    %256 = arith.truncf %253 : vector<16x8xf32> to vector<16x8xbf16>
    %cst_96 = arith.constant dense<0.000000e+00> : vector<16x16xf32>
    %257 = tpu.matmul %255, %256, %cst_96 {dimension_numbers = #tpu.dot_dimension_numbers<[1], [1], [0], [0], [0, 0, 1, 0], [], []>} : vector<16x8xbf16>, vector<16x8xbf16>, vector<16x16xf32> -> vector<16x16xf32>
    %cst_97 = arith.constant 0.353553385 : f32
    %258 = vector.broadcast %cst_97 : f32 to vector<16x16xf32>
    %259 = arith.mulf %257, %258 : vector<16x16xf32>
    %260 = arith.addf %259, %11 : vector<16x16xf32>
    %cst_98 = arith.constant dense<0xFF800000> : vector<16xf32>
    %261 = vector.multi_reduction <maximumf>, %260, %cst_98 [1] : vector<16x16xf32> to vector<16xf32>
    %262 = vector.shape_cast %261 : vector<16xf32> to vector<16x1xf32>
    %263 = vector.broadcast %262 : vector<16x1xf32> to vector<16x16xf32>
    %264 = arith.subf %260, %263 : vector<16x16xf32>
    %265 = math.exp %264 : vector<16x16xf32>
    %cst_99 = arith.constant dense<0.000000e+00> : vector<16xf32>
    %266 = vector.multi_reduction <add>, %265, %cst_99 [1] : vector<16x16xf32> to vector<16xf32>
    %267 = vector.shape_cast %266 : vector<16xf32> to vector<16x1xf32>
    %268 = tpu.reciprocal %267 {approx = true} : vector<16x1xf32> -> vector<16x1xf32>
    %269 = vector.broadcast %268 : vector<16x1xf32> to vector<16x16xf32>
    %270 = arith.mulf %265, %269 : vector<16x16xf32>
    %271 = arith.truncf %270 : vector<16x16xf32> to vector<16x16xbf16>
    %272 = arith.truncf %254 : vector<16x8xf32> to vector<16x8xbf16>
    %cst_100 = arith.constant dense<0.000000e+00> : vector<16x8xf32>
    %273 = tpu.matmul %271, %272, %cst_100 {dimension_numbers = #tpu.dot_dimension_numbers<[1], [0], [0], [1], [0, 0, 1, 1], [], []>} : vector<16x16xbf16>, vector<16x8xbf16>, vector<16x8xf32> -> vector<16x8xf32>
    %274 = vector.extract_strided_slice %224 {offsets = [8, 0], sizes = [8, 32], strides = [1, 1]} : vector<32x32xbf16> to vector<8x32xbf16>
    %275 = arith.truncf %273 : vector<16x8xf32> to vector<16x8xbf16>
    %cst_101 = arith.constant dense<0.000000e+00> : vector<16x32xf32>
    %276 = tpu.matmul %275, %274, %cst_101 {dimension_numbers = #tpu.dot_dimension_numbers<[1], [0], [0], [1], [0, 0, 1, 1], [], []>} : vector<16x8xbf16>, vector<8x32xbf16>, vector<16x32xf32> -> vector<16x32xf32>
    %277 = arith.addf %251, %276 : vector<16x32xf32>
    %278 = vector.extract_strided_slice %223 {offsets = [0, 16], sizes = [16, 8], strides = [1, 1]} : vector<16x96xf32> to vector<16x8xf32>
    %279 = vector.extract_strided_slice %223 {offsets = [0, 48], sizes = [16, 8], strides = [1, 1]} : vector<16x96xf32> to vector<16x8xf32>
    %280 = vector.extract_strided_slice %223 {offsets = [0, 80], sizes = [16, 8], strides = [1, 1]} : vector<16x96xf32> to vector<16x8xf32>
    %281 = arith.truncf %278 : vector<16x8xf32> to vector<16x8xbf16>
    %282 = arith.truncf %279 : vector<16x8xf32> to vector<16x8xbf16>
    %cst_102 = arith.constant dense<0.000000e+00> : vector<16x16xf32>
    %283 = tpu.matmul %281, %282, %cst_102 {dimension_numbers = #tpu.dot_dimension_numbers<[1], [1], [0], [0], [0, 0, 1, 0], [], []>} : vector<16x8xbf16>, vector<16x8xbf16>, vector<16x16xf32> -> vector<16x16xf32>
    %cst_103 = arith.constant 0.353553385 : f32
    %284 = vector.broadcast %cst_103 : f32 to vector<16x16xf32>
    %285 = arith.mulf %283, %284 : vector<16x16xf32>
    %286 = arith.addf %285, %11 : vector<16x16xf32>
    %cst_104 = arith.constant dense<0xFF800000> : vector<16xf32>
    %287 = vector.multi_reduction <maximumf>, %286, %cst_104 [1] : vector<16x16xf32> to vector<16xf32>
    %288 = vector.shape_cast %287 : vector<16xf32> to vector<16x1xf32>
    %289 = vector.broadcast %288 : vector<16x1xf32> to vector<16x16xf32>
    %290 = arith.subf %286, %289 : vector<16x16xf32>
    %291 = math.exp %290 : vector<16x16xf32>
    %cst_105 = arith.constant dense<0.000000e+00> : vector<16xf32>
    %292 = vector.multi_reduction <add>, %291, %cst_105 [1] : vector<16x16xf32> to vector<16xf32>
    %293 = vector.shape_cast %292 : vector<16xf32> to vector<16x1xf32>
    %294 = tpu.reciprocal %293 {approx = true} : vector<16x1xf32> -> vector<16x1xf32>
    %295 = vector.broadcast %294 : vector<16x1xf32> to vector<16x16xf32>
    %296 = arith.mulf %291, %295 : vector<16x16xf32>
    %297 = arith.truncf %296 : vector<16x16xf32> to vector<16x16xbf16>
    %298 = arith.truncf %280 : vector<16x8xf32> to vector<16x8xbf16>
    %cst_106 = arith.constant dense<0.000000e+00> : vector<16x8xf32>
    %299 = tpu.matmul %297, %298, %cst_106 {dimension_numbers = #tpu.dot_dimension_numbers<[1], [0], [0], [1], [0, 0, 1, 1], [], []>} : vector<16x16xbf16>, vector<16x8xbf16>, vector<16x8xf32> -> vector<16x8xf32>
    %300 = vector.extract_strided_slice %224 {offsets = [16, 0], sizes = [8, 32], strides = [1, 1]} : vector<32x32xbf16> to vector<8x32xbf16>
    %301 = arith.truncf %299 : vector<16x8xf32> to vector<16x8xbf16>
    %cst_107 = arith.constant dense<0.000000e+00> : vector<16x32xf32>
    %302 = tpu.matmul %301, %300, %cst_107 {dimension_numbers = #tpu.dot_dimension_numbers<[1], [0], [0], [1], [0, 0, 1, 1], [], []>} : vector<16x8xbf16>, vector<8x32xbf16>, vector<16x32xf32> -> vector<16x32xf32>
    %303 = arith.addf %277, %302 : vector<16x32xf32>
    %304 = vector.extract_strided_slice %223 {offsets = [0, 24], sizes = [16, 8], strides = [1, 1]} : vector<16x96xf32> to vector<16x8xf32>
    %305 = vector.extract_strided_slice %223 {offsets = [0, 56], sizes = [16, 8], strides = [1, 1]} : vector<16x96xf32> to vector<16x8xf32>
    %306 = vector.extract_strided_slice %223 {offsets = [0, 88], sizes = [16, 8], strides = [1, 1]} : vector<16x96xf32> to vector<16x8xf32>
    %307 = arith.truncf %304 : vector<16x8xf32> to vector<16x8xbf16>
    %308 = arith.truncf %305 : vector<16x8xf32> to vector<16x8xbf16>
    %cst_108 = arith.constant dense<0.000000e+00> : vector<16x16xf32>
    %309 = tpu.matmul %307, %308, %cst_108 {dimension_numbers = #tpu.dot_dimension_numbers<[1], [1], [0], [0], [0, 0, 1, 0], [], []>} : vector<16x8xbf16>, vector<16x8xbf16>, vector<16x16xf32> -> vector<16x16xf32>
    %cst_109 = arith.constant 0.353553385 : f32
    %310 = vector.broadcast %cst_109 : f32 to vector<16x16xf32>
    %311 = arith.mulf %309, %310 : vector<16x16xf32>
    %312 = arith.addf %311, %11 : vector<16x16xf32>
    %cst_110 = arith.constant dense<0xFF800000> : vector<16xf32>
    %313 = vector.multi_reduction <maximumf>, %312, %cst_110 [1] : vector<16x16xf32> to vector<16xf32>
    %314 = vector.shape_cast %313 : vector<16xf32> to vector<16x1xf32>
    %315 = vector.broadcast %314 : vector<16x1xf32> to vector<16x16xf32>
    %316 = arith.subf %312, %315 : vector<16x16xf32>
    %317 = math.exp %316 : vector<16x16xf32>
    %cst_111 = arith.constant dense<0.000000e+00> : vector<16xf32>
    %318 = vector.multi_reduction <add>, %317, %cst_111 [1] : vector<16x16xf32> to vector<16xf32>
    %319 = vector.shape_cast %318 : vector<16xf32> to vector<16x1xf32>
    %320 = tpu.reciprocal %319 {approx = true} : vector<16x1xf32> -> vector<16x1xf32>
    %321 = vector.broadcast %320 : vector<16x1xf32> to vector<16x16xf32>
    %322 = arith.mulf %317, %321 : vector<16x16xf32>
    %323 = arith.truncf %322 : vector<16x16xf32> to vector<16x16xbf16>
    %324 = arith.truncf %306 : vector<16x8xf32> to vector<16x8xbf16>
    %cst_112 = arith.constant dense<0.000000e+00> : vector<16x8xf32>
    %325 = tpu.matmul %323, %324, %cst_112 {dimension_numbers = #tpu.dot_dimension_numbers<[1], [0], [0], [1], [0, 0, 1, 1], [], []>} : vector<16x16xbf16>, vector<16x8xbf16>, vector<16x8xf32> -> vector<16x8xf32>
    %326 = vector.extract_strided_slice %224 {offsets = [24, 0], sizes = [8, 32], strides = [1, 1]} : vector<32x32xbf16> to vector<8x32xbf16>
    %327 = arith.truncf %325 : vector<16x8xf32> to vector<16x8xbf16>
    %cst_113 = arith.constant dense<0.000000e+00> : vector<16x32xf32>
    %328 = tpu.matmul %327, %326, %cst_113 {dimension_numbers = #tpu.dot_dimension_numbers<[1], [0], [0], [1], [0, 0, 1, 1], [], []>} : vector<16x8xbf16>, vector<8x32xbf16>, vector<16x32xf32> -> vector<16x32xf32>
    %329 = arith.addf %303, %328 : vector<16x32xf32>
    %c0_114 = arith.constant 0 : index
    %c0_115 = arith.constant 0 : index
    %330 = vector.load %arg21[%c0_114, %c0_115] : memref<1x32xf32, #tpu.memory_space<vmem>>, vector<1x32xf32>
    %331 = vector.broadcast %330 : vector<1x32xf32> to vector<16x32xf32>
    %332 = arith.addf %329, %331 : vector<16x32xf32>
    %c0_116 = arith.constant 0 : index
    %c0_117 = arith.constant 0 : index
    %333 = vector.load %arg22[%c0_116, %c0_117] : memref<1x32xf32, #tpu.memory_space<vmem>>, vector<1x32xf32>
    %c0_118 = arith.constant 0 : index
    %c0_119 = arith.constant 0 : index
    %334 = vector.load %arg23[%c0_118, %c0_119] : memref<1x32xf32, #tpu.memory_space<vmem>>, vector<1x32xf32>
    %cst_120 = arith.constant dense<0.000000e+00> : vector<16xf32>
    %335 = vector.multi_reduction <add>, %332, %cst_120 [1] : vector<16x32xf32> to vector<16xf32>
    %336 = vector.shape_cast %335 : vector<16xf32> to vector<16x1xf32>
    %cst_121 = arith.constant 3.200000e+01 : f32
    %337 = vector.broadcast %cst_121 : f32 to vector<16x1xf32>
    %338 = arith.divf %336, %337 : vector<16x1xf32>
    %339 = vector.broadcast %338 : vector<16x1xf32> to vector<16x32xf32>
    %340 = arith.subf %332, %339 : vector<16x32xf32>
    %341 = arith.mulf %340, %340 : vector<16x32xf32>
    %cst_122 = arith.constant dense<0.000000e+00> : vector<16xf32>
    %342 = vector.multi_reduction <add>, %341, %cst_122 [1] : vector<16x32xf32> to vector<16xf32>
    %343 = vector.shape_cast %342 : vector<16xf32> to vector<16x1xf32>
    %cst_123 = arith.constant 3.200000e+01 : f32
    %344 = vector.broadcast %cst_123 : f32 to vector<16x1xf32>
    %345 = arith.divf %343, %344 : vector<16x1xf32>
    %cst_124 = arith.constant 9.99999974E-6 : f32
    %346 = vector.broadcast %cst_124 : f32 to vector<16x1xf32>
    %347 = arith.addf %345, %346 : vector<16x1xf32>
    %348 = math.rsqrt %347 : vector<16x1xf32>
    %349 = vector.broadcast %348 : vector<16x1xf32> to vector<16x32xf32>
    %350 = arith.mulf %340, %349 : vector<16x32xf32>
    %351 = vector.broadcast %333 : vector<1x32xf32> to vector<16x32xf32>
    %352 = arith.mulf %350, %351 : vector<16x32xf32>
    %353 = vector.broadcast %334 : vector<1x32xf32> to vector<16x32xf32>
    %354 = arith.addf %352, %353 : vector<16x32xf32>
    %c0_125 = arith.constant 0 : index
    %c0_126 = arith.constant 0 : index
    %355 = vector.load %arg24[%c0_125, %c0_126] : memref<32x128xbf16, #tpu.memory_space<vmem>>, vector<32x128xbf16>
    %356 = arith.truncf %354 : vector<16x32xf32> to vector<16x32xbf16>
    %cst_127 = arith.constant dense<0.000000e+00> : vector<16x128xf32>
    %357 = tpu.matmul %356, %355, %cst_127 {dimension_numbers = #tpu.dot_dimension_numbers<[1], [0], [0], [1], [0, 0, 1, 1], [], []>} : vector<16x32xbf16>, vector<32x128xbf16>, vector<16x128xf32> -> vector<16x128xf32>
    %c0_128 = arith.constant 0 : index
    %c0_129 = arith.constant 0 : index
    %358 = vector.load %arg25[%c0_128, %c0_129] : memref<1x128xf32, #tpu.memory_space<vmem>>, vector<1x128xf32>
    %359 = vector.broadcast %358 : vector<1x128xf32> to vector<16x128xf32>
    %360 = arith.addf %357, %359 : vector<16x128xf32>
    %cst_130 = arith.constant 5.000000e-01 : f32
    %361 = vector.broadcast %cst_130 : f32 to vector<16x128xf32>
    %362 = arith.mulf %361, %360 : vector<16x128xf32>
    %cst_131 = arith.constant 4.471500e-02 : f32
    %363 = vector.broadcast %cst_131 : f32 to vector<16x128xf32>
    %364 = arith.mulf %363, %360 : vector<16x128xf32>
    %365 = arith.mulf %364, %360 : vector<16x128xf32>
    %366 = arith.mulf %365, %360 : vector<16x128xf32>
    %367 = arith.addf %360, %366 : vector<16x128xf32>
    %cst_132 = arith.constant 0.797884583 : f32
    %368 = vector.broadcast %cst_132 : f32 to vector<16x128xf32>
    %369 = arith.mulf %368, %367 : vector<16x128xf32>
    %370 = math.tanh %369 : vector<16x128xf32>
    %cst_133 = arith.constant 1.000000e+00 : f32
    %371 = vector.broadcast %cst_133 : f32 to vector<16x128xf32>
    %372 = arith.addf %371, %370 : vector<16x128xf32>
    %373 = arith.mulf %362, %372 : vector<16x128xf32>
    %c0_134 = arith.constant 0 : index
    %c0_135 = arith.constant 0 : index
    %374 = vector.load %arg26[%c0_134, %c0_135] : memref<128x32xbf16, #tpu.memory_space<vmem>>, vector<128x32xbf16>
    %375 = arith.truncf %373 : vector<16x128xf32> to vector<16x128xbf16>
    %cst_136 = arith.constant dense<0.000000e+00> : vector<16x32xf32>
    %376 = tpu.matmul %375, %374, %cst_136 {dimension_numbers = #tpu.dot_dimension_numbers<[1], [0], [0], [1], [0, 0, 1, 1], [], []>} : vector<16x128xbf16>, vector<128x32xbf16>, vector<16x32xf32> -> vector<16x32xf32>
    %c0_137 = arith.constant 0 : index
    %c0_138 = arith.constant 0 : index
    %377 = vector.load %arg27[%c0_137, %c0_138] : memref<1x32xf32, #tpu.memory_space<vmem>>, vector<1x32xf32>
    %378 = vector.broadcast %377 : vector<1x32xf32> to vector<16x32xf32>
    %379 = arith.addf %376, %378 : vector<16x32xf32>
    %c0_139 = arith.constant 0 : index
    %c0_140 = arith.constant 0 : index
    %380 = vector.load %arg28[%c0_139, %c0_140] : memref<1x32xf32, #tpu.memory_space<vmem>>, vector<1x32xf32>
    %c0_141 = arith.constant 0 : index
    %c0_142 = arith.constant 0 : index
    %381 = vector.load %arg29[%c0_141, %c0_142] : memref<1x32xf32, #tpu.memory_space<vmem>>, vector<1x32xf32>
    %cst_143 = arith.constant dense<0.000000e+00> : vector<16xf32>
    %382 = vector.multi_reduction <add>, %379, %cst_143 [1] : vector<16x32xf32> to vector<16xf32>
    %383 = vector.shape_cast %382 : vector<16xf32> to vector<16x1xf32>
    %cst_144 = arith.constant 3.200000e+01 : f32
    %384 = vector.broadcast %cst_144 : f32 to vector<16x1xf32>
    %385 = arith.divf %383, %384 : vector<16x1xf32>
    %386 = vector.broadcast %385 : vector<16x1xf32> to vector<16x32xf32>
    %387 = arith.subf %379, %386 : vector<16x32xf32>
    %388 = arith.mulf %387, %387 : vector<16x32xf32>
    %cst_145 = arith.constant dense<0.000000e+00> : vector<16xf32>
    %389 = vector.multi_reduction <add>, %388, %cst_145 [1] : vector<16x32xf32> to vector<16xf32>
    %390 = vector.shape_cast %389 : vector<16xf32> to vector<16x1xf32>
    %cst_146 = arith.constant 3.200000e+01 : f32
    %391 = vector.broadcast %cst_146 : f32 to vector<16x1xf32>
    %392 = arith.divf %390, %391 : vector<16x1xf32>
    %cst_147 = arith.constant 9.99999974E-6 : f32
    %393 = vector.broadcast %cst_147 : f32 to vector<16x1xf32>
    %394 = arith.addf %392, %393 : vector<16x1xf32>
    %395 = math.rsqrt %394 : vector<16x1xf32>
    %396 = vector.broadcast %395 : vector<16x1xf32> to vector<16x32xf32>
    %397 = arith.mulf %387, %396 : vector<16x32xf32>
    %398 = vector.broadcast %380 : vector<1x32xf32> to vector<16x32xf32>
    %399 = arith.mulf %397, %398 : vector<16x32xf32>
    %400 = vector.broadcast %381 : vector<1x32xf32> to vector<16x32xf32>
    %401 = arith.addf %399, %400 : vector<16x32xf32>
    %402 = arith.truncf %401 : vector<16x32xf32> to vector<16x32xbf16>
    %cst_148 = arith.constant dense<0.000000e+00> : vector<16x128xf32>
    %403 = tpu.matmul %402, %0, %cst_148 {dimension_numbers = #tpu.dot_dimension_numbers<[1], [1], [0], [0], [0, 0, 1, 0], [], []>} : vector<16x32xbf16>, vector<128x32xbf16>, vector<16x128xf32> -> vector<16x128xf32>
    %c0_149 = arith.constant 0 : index
    %c0_150 = arith.constant 0 : index
    %404 = vector.load %arg30[%c0_149, %c0_150] : memref<16x128xf32, #tpu.memory_space<vmem>>, vector<16x128xf32>
    tpu.vector_store %arg30[%c0_149, %c0_150], %403 {strides = array<i32>} : memref<16x128xf32, #tpu.memory_space<vmem>>, vector<16x128xf32>,
    return
  }
}

</mosaic_0001>

<bundles_post_ra>
// kernel: tpu_custom_call.1
= control target key start
LH: loop header
LB: loop body
LE: loop exit
PB: predicated region body
PF: predicated region fallthrough
CT: control target
= control target key end

     0   :  { %s3190_s6 = smov 1   ;;  %s3191_s10 = smov 2   ;;  %s3791_s0 = inlined_call_operand.smem [shape: u32[31], index: -1, kind: input, shape index: {}] }
   0x1   :  { %s3246_s5 = sld [smem:[%s3791_s0]]   ;;  %s3192_s14 = smov 3  }
   0x2   :  { %s3251_s9 = sld [smem:[%s3791_s0 + %s3190_s6]]   ;;  %s3193_s18 = smov 4  }
   0x3   :  { %s3256_s13 = sld [smem:[%s3791_s0 + %s3191_s10]]   ;;  %s3194_s22 = smov 5  }
   0x4   :  { %s3261_s17 = sld [smem:[%s3791_s0 + %s3192_s14]]   ;;  %s3195_s26 = smov 6  }
   0x5   :  { %s3266_s21 = sld [smem:[%s3791_s0 + %s3193_s18]]   ;;  %s3196_s30 = smov 7  }
   0x6   :  { %s3271_s25 = sld [smem:[%s3791_s0 + %s3194_s22]]   ;;  %s3197_s4 = smov 8  }
   0x7   :  { %s3276_s29 = sld [smem:[%s3791_s0 + %s3195_s26]]   ;;  %s3198_s10 = smov 9  }
   0x8   :  { %s3281_s3 = sld [smem:[%s3791_s0 + %s3196_s30]]   ;;  %s3199_s15 = smov 10  }
   0x9   :  { %s3286_s8 = sld [smem:[%s3791_s0 + %s3197_s4]]   ;;  %s3200_s20 = smov 11  }
   0xa   :  { %s3291_s14 = sld [smem:[%s3791_s0 + %s3198_s10]]   ;;  %s3201_s26 = smov 12  }
   0xb   :  { %s3296_s19 = sld [smem:[%s3791_s0 + %s3199_s15]]   ;;  %s3202_s1 = smov 13  }
   0xc   :  { %s3301_s24 = sld [smem:[%s3791_s0 + %s3200_s20]]   ;;  %s3203_s7 = smov 14  }
   0xd   :  { %s3306_s30 = sld [smem:[%s3791_s0 + %s3201_s26]]   ;;  %s3204_s15 = smov 15  }
   0xe   :  { %s3311_s6 = sld [smem:[%s3791_s0 + %s3202_s1]]   ;;  %s3205_s22 = smov 16  }
   0xf   :  { %s3316_s12 = sld [smem:[%s3791_s0 + %s3203_s7]]   ;;  %s3206_s28 = smov 17  }
  0x10   :  { %s3321_s20 = sld [smem:[%s3791_s0 + %s3204_s15]]   ;;  %s3207_s7 = smov 18  }
  0x11   :  { %s3326_s27 = sld [smem:[%s3791_s0 + %s3205_s22]]   ;;  %s3208_s15 = smov 19  }
  0x12   :  { %s3331_s4 = sld [smem:[%s3791_s0 + %s3206_s28]]   ;;  %s3209_s22 = smov 20  }
  0x13   :  { %s3210_s28 = smov 21  }
  0x14   :  { %3796 = sst [smem:[#allocation5_spill]] %s3311_s6 }
  0x15   :  { %s3336_s6 = sld [smem:[%s3791_s0 + %s3207_s7]]   ;;  %s3211_s7 = smov 22  }
  0x16   :  { %3797 = sst [smem:[#allocation6_spill]] %s3321_s20 }
  0x17   :  { %3798 = sst [smem:[#allocation7_spill]] %s3326_s27 }
  0x18   :  { %3799 = sst [smem:[#allocation8_spill]] %s3331_s4 }
  0x19   :  { %s3341_s20 = sld [smem:[%s3791_s0 + %s3208_s15]]   ;;  %s3212_s15 = smov 23  }
  0x1a   :  { %s3346_s27 = sld [smem:[%s3791_s0 + %s3209_s22]]   ;;  %s3213_s22 = smov 24  }
  0x1b   :  { %3800 = sst [smem:[#allocation9_spill]] %s3336_s6 }
  0x1c   :  { %s3351_s4 = sld [smem:[%s3791_s0 + %s3210_s28]]   ;;  %s3214_s28 = smov 25  }
  0x1d   :  { %s3356_s6 = sld [smem:[%s3791_s0 + %s3211_s7]]   ;;  %s3215_s7 = smov 26  }
  0x1f   :  { %3801 = sst [smem:[#allocation10_spill]] %s3341_s20 }
  0x20   :  { %3802 = sst [smem:[#allocation11_spill]] %s3346_s27 }
  0x21   :  { %s3361_s20 = sld [smem:[%s3791_s0 + %s3212_s15]]   ;;  %s3216_s15 = smov 27  }
  0x22   :  { %3803 = sst [smem:[#allocation12_spill]] %s3351_s4 }
  0x23   :  { %3804 = sst [smem:[#allocation13_spill]] %s3356_s6 }
  0x24   :  { %s3366_s27 = sld [smem:[%s3791_s0 + %s3213_s22]]   ;;  %s3217_s22 = smov 28  }
  0x25   :  { %s3371_s4 = sld [smem:[%s3791_s0 + %s3214_s28]]   ;;  %s3218_s28 = smov 29  }
  0x26   :  { %s3376_s6 = sld [smem:[%s3791_s0 + %s3215_s7]]   ;;  %s3219_s7 = smov 30  }
  0x27   :  { %3805 = sst [smem:[#allocation14_spill]] %s3361_s20 }
  0x28   :  { %s3381_s20 = sld [smem:[%s3791_s0 + %s3216_s15]]  }
  0x2a   :  { %3806 = sst [smem:[#allocation15_spill]] %s3366_s27 }
  0x2b   :  { %3807 = sst [smem:[#allocation16_spill]] %s3371_s4 }
  0x2c   :  { %3808 = sst [smem:[#allocation17_spill]] %s3376_s6 }
  0x2d   :  { %s3386_s27 = sld [smem:[%s3791_s0 + %s3217_s22]]  }
  0x2e   :  { %s3391_s4 = sld [smem:[%s3791_s0 + %s3218_s28]]  }
  0x2f   :  { %s3396_s6 = sld [smem:[%s3791_s0 + %s3219_s7]]  }
  0x30   :  { %v144_v0 = vld [vmem:[%s3246_s5] sm:$0xff]  ;;  %v3220_v1 = vmov 0   ;;  %v3221_v2 = vmov 0.0   ;;  %v145_v4 = vld [vmem:[%s3246_s5 + $0x8] sm:$0xff]  ;;  %v3034_v6 = vld [vmem:[%s3251_s9 + $0x10] sm:$0xff]   ;;  %vm3222_vm0 = vmmov 0  }
  0x31   :  { %3031 = vset.pattern.permute.xlu0 %v3220_v1  ;;  %2727 = vmatprep.subr.bf16.mxu0 %v3221_v2  ;;  %v3032_v3 = vld [vmem:[%s3251_s9] sm:$0xff]   ;;  %v3033_v5 = vld [vmem:[%s3251_s9 + $0x8] sm:$0xff]   ;;  %v3035_v7 = vld [vmem:[%s3251_s9 + $0x18] sm:$0xff]  }
  0x32   :  { %149 = vperm.xlu0 %3031, %v144_v0   ;;  %2761 = vmatprep.subr.bf16.mxu1 %v3221_v2  ;;  %v3036_v8 = vld [vmem:[%s3251_s9 + $0x20] sm:$0xff]   ;;  %v3037_v9 = vld [vmem:[%s3251_s9 + $0x28] sm:$0xff]   ;;  %v3038_v10 = vld [vmem:[%s3251_s9 + $0x30] sm:$0xff]  }
  0x33   :  { %2728 = vmatpush3.bf16.msra.mxu0 %v3032_v3  ;;  %2743 = vmatprep.mubr.msk.bf16.mxu0 %vm3222_vm0, %v3221_v2 }
  0x34   :  { %2729 = vmatprep.subr.bf16.mxu0 %v3221_v2  ;;  %2763 = vmatprep.mubr.msk.bf16.mxu1 %vm3222_vm0, %v3221_v2 }
  0x36   :  { %152 = vperm.xlu0 %3031, %v145_v4  }
  0x37   :  { %2730 = vmatpush3.bf16.msra.mxu0 %v3033_v5 }
  0x38   :  { %2731 = vmatprep.subr.bf16.mxu0 %v3221_v2 }
  0x3b   :  { %2732 = vmatpush3.bf16.msra.mxu0 %v3034_v6 }
  0x3c   :  { %2733 = vmatprep.subr.bf16.mxu0 %v3221_v2 }
  0x3f   :  { %2734 = vmatpush3.bf16.msra.mxu0 %v3035_v7 }
  0x40   :  { %2735 = vmatprep.subr.bf16.mxu0 %v3221_v2 }
  0x43   :  { %2736 = vmatpush3.bf16.msra.mxu0 %v3036_v8 }
  0x44   :  { %2737 = vmatprep.subr.bf16.mxu0 %v3221_v2 }
  0x47   :  { %2738 = vmatpush3.bf16.msra.mxu0 %v3037_v9 }
  0x48   :  { %2739 = vmatprep.subr.bf16.mxu0 %v3221_v2 }
  0x49   :  { %66 = vsyncpa [#allocation3], 0  ;;  %v3039_v11 = vld [vmem:[%s3251_s9 + $0x38] sm:$0xff]   ;;  %v146_v12 = vlaneseq  ;;  %v3223_v16 = vmov 1.0|1.0   ;;  %v161_v17 = vld [vmem:[%s3256_s13] sm:$0xff] }
  0x4a   :  { %v162_v19 = vld [vmem:[%s3256_s13 + $0x8] sm:$0xff]  ;;  %vm256_vm4 = vcmask 261120   ;;  %v3040_v37 = vld [vmem:[%s3276_s29] sm:$0xff]   ;;  %s3224_s0 = smov 96   ;;  %vm376_vm5 = vcmask 64512   ;;  %vm428_vm6 = vcmask 130048  }
  0x4b   :  { %2740 = vmatpush3.bf16.msra.mxu0 %v3038_v10  ;;  %v147_v14 = vand.u32 127, %v146_v12  ;;  %v3041_v38 = vld [vmem:[%s3276_s29 + $0x8] sm:$0xff]   ;;  %v2560_v47 = vld [vmem:[%s3266_s21] ss:$0 sm:$0xff]  ;;  %s3225_s5 = smov 88   ;;  %s3226_s13 = smov 64  }
  0x4c   :  { %2741 = vmatprep.subr.bf16.mxu0 %v3221_v2  ;;  %v2561_v51 = vld [vmem:[%s3271_s25] ss:$0 sm:$0xff]  ;;  %v3454_v8 = vld [vmem:[%s3261_s17 + $0x8] sm:$0xff]  ;;  %s3227_s21 = smov 120   ;;  %s3228_s25 = smov 80   ;;  %vm629_vm7 = vcmask 1043456  }
  0x4d   :  { %v2562_v56 = vld [vmem:[%s3281_s3] ss:$0 sm:$0xff]  ;;  %s3229_s29 = smov 112   ;;  %s3230_s3 = smov 56  }
  0x4e   :  { %v3451_v4 = vld [vmem:[%s3261_s17] sm:$0xff]  ;;  %s3231_s15 = smov 48   ;;  %s3232_s16 = smov 104  }
  0x4f   :  { %2742 = vmatpush3.bf16.msra.mxu0 %v3039_v11  ;;  %s3233_s18 = smov 72   ;;  %s3234_s22 = smov 40  }
  0x50   :  { %2747 = vmatprep.subr.bf16.mxu0 %v3221_v2  ;;  %s3815_s23 = sld [smem:[#allocation11_spill]]  ;;  %s3817_s26 = sld [smem:[#allocation15_spill]] }
  0x51   :  { %s3818_s28 = sld [smem:[#allocation13_spill]]  ;;  %s3819_s1 = sld [smem:[#allocation14_spill]] }
  0x52   :  { %s3820_s2 = sld [smem:[#allocation17_spill]]  ;;  %s3821_s7 = sld [smem:[#allocation16_spill]] }
  0xb1   :  { %v150_v13 = vpop.permute.xlu0 %149 }
  0xb2   :  { %vm154_vm1 = vcmp.eq.s32.totalorder %v147_v14, %v150_v13 }
  0xb5   :  { %v153_v15 = vpop.permute.xlu0 %152 }
  0xb6   :  { %vm155_vm2 = vcmp.eq.s32.totalorder %v147_v14, %v153_v15 }
  0xb7   :  { %vm2558_vm3 = vmpackc.low %vm155_vm2, %vm154_vm1 }
  0xb8   :  { %2744 = vmatmul.mubr.msk.bf16.vlgmr.msra.gmra.mrb[0].mxu0 %vm2558_vm3, %v3223_v16 }
  0xb9   :  { %2751 = vmatprep.mubr.msk.bf16.mxu0 %vm3222_vm0, %v3221_v2  ;;  %2748 = vmatpush3.bf16.msra.mxu0 %v3040_v37 }
  0xba   :  { %2749 = vmatprep.subr.bf16.mxu0 %v3221_v2 }
  0xbd   :  { %2750 = vmatpush3.bf16.msra.mxu0 %v3041_v38 }
  0xbe   :  { %2755 = vmatprep.subr.bf16.mxu0 %v3221_v2 }
 0x18b   :  { %v245_v18 = vpop.f32.mrb[0].mxu0 }
 0x18c   :  { %v246_v20 = vadd.f32 %v245_v18, %v161_v17  ;;  %v2745_v21 = vpop.f32.mrb[1].mxu0 }
 0x18d   :  { %v248_v22 = vpop.f32.mrb[2].mxu0 }
 0x18e   :  { %v249_v23 = vadd.f32 %v248_v22, %v162_v19  ;;  %v2746_v24 = vpop.f32.mrb[3].mxu0  ;;  %v257_v25 = vsel %vm256_vm4, %v246_v20, 0.0 }
 0x18f   :  { %258 = vadd.xlane.f32.xlu1 %v257_v25 }
 0x190   :  { %v260_v26 = vsel %vm256_vm4, %v249_v23, 0.0 }
 0x193   :  { %261 = vadd.xlane.f32.xlu1 %v260_v26 }
 0x21c   :  { %v259_v27 = vpop.xlane.xlu1 %258 }
 0x21d   :  { %v264_v28 = vmul.f32 0.03125, %v259_v27 }
 0x21f   :  { %v266_v29 = vsub.f32 %v246_v20, %v264_v28 }
 0x220   :  { %v262_v30 = vpop.xlane.xlu1 %261 }
 0x221   :  { %v265_v31 = vmul.f32 0.03125, %v262_v30  ;;  %v268_v32 = vmul.f32 %v266_v29, %v266_v29 }
 0x223   :  { %v267_v33 = vsub.f32 %v249_v23, %v265_v31  ;;  %v270_v34 = vsel %vm256_vm4, %v268_v32, 0.0 }
 0x224   :  { %271 = vadd.xlane.f32.xlu0 %v270_v34 }
 0x225   :  { %v269_v35 = vmul.f32 %v267_v33, %v267_v33 }
 0x227   :  { %v273_v36 = vsel %vm256_vm4, %v269_v35, 0.0 }
 0x228   :  { %274 = vadd.xlane.f32.xlu1 %v273_v36 }
 0x2b1   :  { %v272_v39 = vpop.xlane.xlu0 %271 }
 0x2b2   :  { %v276_v40 = vmul.f32 0.03125, %v272_v39 }
 0x2b4   :  { %v278_v41 = vadd.f32 1e-05, %v276_v40 }
 0x2b5   :  { %v275_v42 = vpop.xlane.xlu1 %274 }
 0x2b6   :  { %3064 = vrsqrt.f32 %v278_v41  ;;  %v277_v43 = vmul.f32 0.03125, %v275_v42 }
 0x2b8   :  { %v279_v44 = vadd.f32 1e-05, %v277_v43 }
 0x2ba   :  { %3066 = vrsqrt.f32 %v279_v44 }
 0x2c0   :  { %v3065_v45 = vpop.eup %3064 }
 0x2c1   :  { %v282_v46 = vmul.f32 %v3065_v45, %v266_v29 }
 0x2c3   :  { %v290_v49 = vmul.f32 %v2560_v47, %v282_v46 }
 0x2c4   :  { %v3067_v48 = vpop.eup %3066 }
 0x2c5   :  { %v283_v50 = vmul.f32 %v3067_v48, %v267_v33  ;;  %v298_v53 = vadd.f32 %v2561_v51, %v290_v49 }
 0x2c7   :  { %v291_v52 = vmul.f32 %v2560_v47, %v283_v50 }
 0x2c9   :  { %v299_v54 = vadd.f32 %v2561_v51, %v291_v52 }
 0x2cb   :  { %v304_v55 = vpack.c.bf16 %v299_v54, %v298_v53 }
 0x2cd   :  { %2752 = vmatmul.mubr.msk.bf16.vlgmr.msra.gmra.mrb[4].mxu0 %vm256_vm4, %v304_v55 }
 0x2ce   :  { %2757 = vmatprep.mubr.msk.bf16.mxu0 %vm3222_vm0, %v3221_v2 }
 0x3a0   :  { %v361_v57 = vpop.f32.mrb[4].mxu0 }
 0x3a1   :  { %v2753_v58 = vpop.f32.mrb[5].mxu0  ;;  %v362_v60 = vadd.f32 %v2562_v56, %v361_v57 }
 0x3a2   :  { %v364_v59 = vpop.f32.mrb[6].mxu0 }
 0x3a3   :  { %v365_v61 = vadd.f32 %v2562_v56, %v364_v59  ;;  %v2754_v62 = vpop.f32.mrb[7].mxu0 }
 0x3a5   :  { %v3440_v63 = vpack.c.bf16 %v365_v61, %v362_v60  ;;  %v369_v61 = vld [vmem:[%s3286_s8 + $0x4] sm:$0xf] }
 0x3a6   :  { %v631_v62 = vsel %vm629_vm7, %v369_v61, 0 }
 0x3a7   :  { %374 = vrot.lane.b32.xlu1 %v3440_v63, %s3224_s0 }
 0x419   :  { %v375_v0 = vpop.permute.xlu1 %374 }
 0x41a   :  { %v381_v1 = vsel %vm376_vm5, %v375_v0, 0 }
 0x41b   :  { %2756 = vmatpush3.bf16.xpose.msra.mxu0 %v381_v1 }
 0x41c   :  { %2773 = vmatprep.subr.bf16.mxu0 %v3221_v2 }
 0x422   :  { %2758 = vmatmul.mubr.msk.bf16.vlgmr.msra.gmra.mrb[8].mxu0 %vm376_vm5, %v3440_v63 }
 0x423   :  { %2775 = vmatprep.mubr.msk.bf16.mxu0 %vm3222_vm0, %v3221_v2 }
 0x4f5   :  { %v417_v3 = vpop.f32.mrb[8].mxu0 }
 0x4f6   :  { %v424_v5 = vmul.f32 0.35355338, %v417_v3  ;;  %v2759_v6 = vpop.f32.mrb[9].mxu0 }
 0x4f7   :  { %v420_v7 = vpop.f32.mrb[10].mxu0 }
 0x4f8   :  { %v425_v9 = vmul.f32 0.35355338, %v420_v7  ;;  %v2760_v10 = vpop.f32.mrb[11].mxu0  ;;  %v426_v11 = vadd.f32 %v424_v5, %v3451_v4  ;;  %v368_v7 = vld [vmem:[%s3286_s8] sm:$0xf] }
 0x4fa   :  { %v429_v12 = vsel %vm428_vm6, %v426_v11, -inf  ;;  %v427_v13 = vadd.f32 %v425_v9, %v3454_v8 }
 0x4fb   :  { %430 = vmax.xlane.f32.xlu1 %v429_v12  ;;  %v678_v12 = vsel %vm629_vm7, %v368_v7, 0 }
 0x4fc   :  { %v432_v14 = vsel %vm428_vm6, %v427_v13, -inf }
 0x4fd   :  { %433 = vmax.xlane.f32.xlu0 %v432_v14 }
 0x50c   :  { %502 = vrot.lane.b32.xlu1 %v3440_v63, %s3225_s5 }
 0x588   :  { %v431_v15 = vpop.xlane.xlu1 %430 }
 0x589   :  { %v435_v16 = vsub.f32 %v426_v11, %v431_v15 }
 0x58a   :  { %v434_v17 = vpop.xlane.xlu0 %433 }
 0x58b   :  { %v437_v18 = vmul.f32 1.442695, %v435_v16  ;;  %v436_v19 = vsub.f32 %v427_v13, %v434_v17 }
 0x58c   :  { %v503_v32 = vpop.permute.xlu1 %502 }
 0x58d   :  { %3068 = vpow2.f32 %v437_v18  ;;  %v439_v20 = vmul.f32 1.442695, %v436_v19  ;;  %v508_v34 = vsel %vm376_vm5, %v503_v32, 0 }
 0x58f   :  { %3070 = vpow2.f32 %v439_v20 }
 0x597   :  { %v3069_v21 = vpop.eup %3068 }
 0x598   :  { %v441_v22 = vsel %vm428_vm6, %v3069_v21, 0.0 }
 0x599   :  { %v3071_v23 = vpop.eup %3070  ;;  %442 = vadd.xlane.f32.xlu0 %v441_v22 }
 0x59a   :  { %v444_v24 = vsel %vm428_vm6, %v3071_v23, 0.0 }
 0x59d   :  { %445 = vadd.xlane.f32.xlu0 %v444_v24 }
 0x5b3   :  { %452 = vrot.lane.b32.xlu0 %v3440_v63, %s3226_s13 }
 0x5b7   :  { %500 = vrot.lane.b32.xlu0 %v3440_v63, %s3227_s21 }
 0x626   :  { %v443_v25 = vpop.xlane.xlu0 %442 }
 0x627   :  { %3072 = vrcp.f32 %v443_v25 }
 0x62a   :  { %v446_v26 = vpop.xlane.xlu0 %445 }
 0x62b   :  { %3074 = vrcp.f32 %v446_v26 }
 0x62e   :  { %v453_v27 = vpop.permute.xlu0 %452 }
 0x62f   :  { %2762 = vmatpush3.bf16.msra.mxu1 %v453_v27 }
 0x630   :  { %2767 = vmatprep.subr.bf16.mxu1 %v3221_v2 }
 0x631   :  { %v3073_v28 = vpop.eup %3072 }
 0x632   :  { %v449_v30 = vmul.f32 %v3073_v28, %v3069_v21  ;;  %v501_v35 = vpop.permute.xlu0 %500 }
 0x635   :  { %v3075_v29 = vpop.eup %3074 }
 0x636   :  { %v450_v31 = vmul.f32 %v3075_v29, %v3071_v23 }
 0x638   :  { %v451_v33 = vpack.c.bf16 %v450_v31, %v449_v30 }
 0x63a   :  { %2764 = vmatmul.mubr.msk.bf16.vlgmr.msra.gmra.mrb[0].mxu1 %vm428_vm6, %v451_v33 }
 0x63b   :  { %2768 = vmatpush3.bf16.xpose.msra.mxu1 %v508_v34  ;;  %2769 = vmatprep.mubr.msk.bf16.mxu1 %vm3222_vm0, %v3221_v2 }
 0x63c   :  { %2779 = vmatprep.subr.bf16.mxu1 %v3221_v2 }
 0x642   :  { %2770 = vmatmul.mubr.msk.bf16.vlgmr.msra.gmra.mrb[4].mxu1 %vm376_vm5, %v501_v35 }
 0x643   :  { %2781 = vmatprep.mubr.msk.bf16.mxu1 %vm3222_vm0, %v3221_v2  ;;  %2780 = vmatpush3.bf16.msra.mxu1 %v631_v62  ;;  %v370_v62 = vld [vmem:[%s3286_s8 + $0x8] sm:$0xf] }
 0x644   :  { %2791 = vmatprep.subr.bf16.mxu1 %v3221_v2 }
 0x70d   :  { %v492_v36 = vpop.f32.mrb[0].mxu1 }
 0x70e   :  { %v2765_v37 = vpop.f32.mrb[1].mxu1 }
 0x70f   :  { %v495_v38 = vpop.f32.mrb[2].mxu1 }
 0x710   :  { %v499_v39 = vpack.c.bf16 %v495_v38, %v492_v36  ;;  %v2766_v40 = vpop.f32.mrb[3].mxu1 }
 0x715   :  { %v544_v41 = vpop.f32.mrb[4].mxu1 }
 0x716   :  { %v551_v42 = vmul.f32 0.35355338, %v544_v41  ;;  %v2771_v43 = vpop.f32.mrb[5].mxu1 }
 0x717   :  { %v547_v44 = vpop.f32.mrb[6].mxu1 }
 0x718   :  { %v552_v45 = vmul.f32 0.35355338, %v547_v44  ;;  %v2772_v46 = vpop.f32.mrb[7].mxu1  ;;  %v553_v47 = vadd.f32 %v551_v42, %v3451_v4 }
 0x71a   :  { %v555_v48 = vsel %vm428_vm6, %v553_v47, -inf  ;;  %v554_v49 = vadd.f32 %v552_v45, %v3454_v8 }
 0x71b   :  { %556 = vmax.xlane.f32.xlu0 %v555_v48 }
 0x71c   :  { %v558_v50 = vsel %vm428_vm6, %v554_v49, -inf }
 0x71d   :  { %559 = vmax.xlane.f32.xlu1 %v558_v50 }
 0x72e   :  { %723 = vrot.lane.b32.xlu1 %v3440_v63, %s3228_s25 }
 0x732   :  { %721 = vrot.lane.b32.xlu1 %v3440_v63, %s3229_s29 }
 0x7a8   :  { %v557_v51 = vpop.xlane.xlu0 %556 }
 0x7a9   :  { %v561_v52 = vsub.f32 %v553_v47, %v557_v51 }
 0x7aa   :  { %v560_v53 = vpop.xlane.xlu1 %559 }
 0x7ab   :  { %v563_v54 = vmul.f32 1.442695, %v561_v52  ;;  %v562_v55 = vsub.f32 %v554_v49, %v560_v53 }
 0x7ad   :  { %3076 = vpow2.f32 %v563_v54  ;;  %v565_v56 = vmul.f32 1.442695, %v562_v55 }
 0x7ae   :  { %v724_v15 = vpop.permute.xlu1 %723 }
 0x7af   :  { %3078 = vpow2.f32 %v565_v56  ;;  %v729_v19 = vsel %vm376_vm5, %v724_v15, 0 }
 0x7b2   :  { %v722_v24 = vpop.permute.xlu1 %721 }
 0x7b7   :  { %v3077_v57 = vpop.eup %3076 }
 0x7b8   :  { %v567_v58 = vsel %vm428_vm6, %v3077_v57, 0.0 }
 0x7b9   :  { %v3079_v59 = vpop.eup %3078  ;;  %568 = vadd.xlane.f32.xlu0 %v567_v58 }
 0x7ba   :  { %v570_v60 = vsel %vm428_vm6, %v3079_v59, 0.0 }
 0x7bd   :  { %571 = vadd.xlane.f32.xlu0 %v570_v60 }
 0x7d3   :  { %578 = vrot.lane.b32.xlu0 %v3440_v63, %s3230_s3 }
 0x846   :  { %v569_v0 = vpop.xlane.xlu0 %568 }
 0x847   :  { %3080 = vrcp.f32 %v569_v0  ;;  %v851_v0 = vsel %vm629_vm7, %v370_v62, 0 }
 0x84a   :  { %v572_v1 = vpop.xlane.xlu0 %571 }
 0x84b   :  { %3082 = vrcp.f32 %v572_v1 }
 0x84e   :  { %v579_v3 = vpop.permute.xlu0 %578 }
 0x84f   :  { %2774 = vmatpush3.bf16.msra.mxu0 %v579_v3 }
 0x850   :  { %2785 = vmatprep.subr.bf16.mxu0 %v3221_v2 }
 0x851   :  { %v3081_v5 = vpop.eup %3080 }
 0x852   :  { %v575_v9 = vmul.f32 %v3081_v5, %v3077_v57 }
 0x855   :  { %v3083_v6 = vpop.eup %3082 }
 0x856   :  { %v576_v10 = vmul.f32 %v3083_v6, %v3079_v59 }
 0x858   :  { %v577_v11 = vpack.c.bf16 %v576_v10, %v575_v9 }
 0x85a   :  { %2776 = vmatmul.mubr.msk.bf16.vlgmr.msra.gmra.mrb[12].mxu0 %vm428_vm6, %v577_v11 }
 0x85b   :  { %2786 = vmatpush3.bf16.msra.mxu0 %v678_v12  ;;  %2787 = vmatprep.mubr.msk.bf16.mxu0 %vm3222_vm0, %v3221_v2 }
 0x85c   :  { %2797 = vmatprep.subr.bf16.mxu0 %v3221_v2 }
 0x862   :  { %2788 = vmatmul.mubr.msk.bf16.vlgmr.msra.gmra.mrb[16].mxu0 %vm376_vm5, %v499_v39 }
 0x863   :  { %2799 = vmatprep.mubr.msk.bf16.mxu0 %vm3222_vm0, %v3221_v2 }
 0x92d   :  { %v618_v13 = vpop.f32.mrb[12].mxu0 }
 0x92e   :  { %v2777_v14 = vpop.f32.mrb[13].mxu0 }
 0x92f   :  { %v621_v16 = vpop.f32.mrb[14].mxu0 }
 0x930   :  { %v625_v17 = vpack.c.bf16 %v621_v16, %v618_v13  ;;  %v2778_v18 = vpop.f32.mrb[15].mxu0 }
 0x932   :  { %2782 = vmatmul.mubr.msk.bf16.vlgmr.msra.gmra.mrb[8].mxu1 %vm376_vm5, %v625_v17 }
 0x933   :  { %2792 = vmatpush3.bf16.xpose.msra.mxu1 %v729_v19  ;;  %2793 = vmatprep.mubr.msk.bf16.mxu1 %vm3222_vm0, %v3221_v2 }
 0x934   :  { %2803 = vmatprep.subr.bf16.mxu1 %v3221_v2 }
 0x935   :  { %v714_v20 = vpop.f32.mrb[16].mxu0 }
 0x936   :  { %v2789_v21 = vpop.f32.mrb[17].mxu0 }
 0x937   :  { %v717_v22 = vpop.f32.mrb[18].mxu0 }
 0x938   :  { %v2790_v23 = vpop.f32.mrb[19].mxu0 }
 0x93a   :  { %2794 = vmatmul.mubr.msk.bf16.vlgmr.msra.gmra.mrb[12].mxu1 %vm376_vm5, %v722_v24 }
 0x93b   :  { %2805 = vmatprep.mubr.msk.bf16.mxu1 %vm3222_vm0, %v3221_v2  ;;  %2804 = vmatpush3.bf16.msra.mxu1 %v851_v0 }
 0x93c   :  { %2815 = vmatprep.subr.bf16.mxu1 %v3221_v2 }
 0xa05   :  { %v667_v25 = vpop.f32.mrb[8].mxu1 }
 0xa06   :  { %v3510_v26 = vadd.f32 %v714_v20, %v667_v25  ;;  %v2783_v27 = vpop.f32.mrb[9].mxu1 }
 0xa07   :  { %v670_v28 = vpop.f32.mrb[10].mxu1 }
 0xa08   :  { %v3512_v29 = vadd.f32 %v717_v22, %v670_v28  ;;  %v2784_v30 = vpop.f32.mrb[11].mxu1 }
 0xa0d   :  { %v765_v31 = vpop.f32.mrb[12].mxu1 }
 0xa0e   :  { %v772_v32 = vmul.f32 0.35355338, %v765_v31  ;;  %v2795_v33 = vpop.f32.mrb[13].mxu1  ;;  %v371_v31 = vld [vmem:[%s3286_s8 + $0xc] sm:$0xf]  ;;  %s3809_s8 = sld [smem:[#allocation5_spill]] }
 0xa0f   :  { %v768_v34 = vpop.f32.mrb[14].mxu1 }
 0xa10   :  { %v773_v35 = vmul.f32 0.35355338, %v768_v34  ;;  %v2796_v36 = vpop.f32.mrb[15].mxu1  ;;  %v774_v37 = vadd.f32 %v772_v32, %v3451_v4  ;;  %v1026_v32 = vsel %vm629_vm7, %v371_v31, 0  ;;  %v3044_v31 = vld [vmem:[%s3316_s12] sm:$0xff]  }
 0xa12   :  { %v776_v38 = vsel %vm428_vm6, %v774_v37, -inf  ;;  %v775_v39 = vadd.f32 %v773_v35, %v3454_v8 }
 0xa13   :  { %777 = vmax.xlane.f32.xlu0 %v776_v38 }
 0xa14   :  { %v779_v40 = vsel %vm428_vm6, %v775_v39, -inf }
 0xa15   :  { %780 = vmax.xlane.f32.xlu1 %v779_v40 }
 0xa26   :  { %799 = vrot.lane.b32.xlu1 %v3440_v63, %s3231_s15 }
 0xa2a   :  { %896 = vrot.lane.b32.xlu1 %v3440_v63, %s3232_s16 }
 0xaa0   :  { %v778_v41 = vpop.xlane.xlu0 %777 }
 0xaa1   :  { %v782_v42 = vsub.f32 %v774_v37, %v778_v41 }
 0xaa2   :  { %v781_v43 = vpop.xlane.xlu1 %780 }
 0xaa3   :  { %v784_v44 = vmul.f32 1.442695, %v782_v42  ;;  %v783_v45 = vsub.f32 %v775_v39, %v781_v43 }
 0xaa5   :  { %3084 = vpow2.f32 %v784_v44  ;;  %v786_v46 = vmul.f32 1.442695, %v783_v45 }
 0xaa6   :  { %v800_v47 = vpop.permute.xlu1 %799 }
 0xaa7   :  { %3086 = vpow2.f32 %v786_v46  ;;  %2798 = vmatpush3.bf16.msra.mxu0 %v800_v47 }
 0xaa8   :  { %2809 = vmatprep.subr.bf16.mxu0 %v3221_v2 }
 0xaaa   :  { %v897_v61 = vpop.permute.xlu1 %896 }
 0xaaf   :  { %v3085_v48 = vpop.eup %3084 }
 0xab0   :  { %v788_v49 = vsel %vm428_vm6, %v3085_v48, 0.0 }
 0xab1   :  { %v3087_v50 = vpop.eup %3086  ;;  %789 = vadd.xlane.f32.xlu0 %v788_v49 }
 0xab2   :  { %v791_v51 = vsel %vm428_vm6, %v3087_v50, 0.0 }
 0xab5   :  { %792 = vadd.xlane.f32.xlu0 %v791_v51 }
 0xacb   :  { %898 = vrot.lane.b32.xlu0 %v3440_v63, %s3233_s18 }
 0xb3e   :  { %v790_v52 = vpop.xlane.xlu0 %789 }
 0xb3f   :  { %3088 = vrcp.f32 %v790_v52 }
 0xb42   :  { %v793_v53 = vpop.xlane.xlu0 %792 }
 0xb43   :  { %3090 = vrcp.f32 %v793_v53 }
 0xb46   :  { %v899_v58 = vpop.permute.xlu0 %898 }
 0xb47   :  { %v904_v60 = vsel %vm376_vm5, %v899_v58, 0 }
 0xb49   :  { %v3089_v54 = vpop.eup %3088 }
 0xb4a   :  { %v796_v56 = vmul.f32 %v3089_v54, %v3085_v48 }
 0xb4d   :  { %v3091_v55 = vpop.eup %3090 }
 0xb4e   :  { %v797_v57 = vmul.f32 %v3091_v55, %v3087_v50  ;;  %v2578_v50 = vld [vmem:[%s3291_s14] ss:$0 sm:$0xff]  ;;  %s3810_s14 = sld [smem:[#allocation6_spill]] }
 0xb50   :  { %v798_v59 = vpack.c.bf16 %v797_v57, %v796_v56 }
 0xb52   :  { %2800 = vmatmul.mubr.msk.bf16.vlgmr.msra.gmra.mrb[20].mxu0 %vm428_vm6, %v798_v59 }
 0xb53   :  { %2810 = vmatpush3.bf16.xpose.msra.mxu0 %v904_v60  ;;  %2811 = vmatprep.mubr.msk.bf16.mxu0 %vm3222_vm0, %v3221_v2 }
 0xb54   :  { %2821 = vmatprep.subr.bf16.mxu0 %v3221_v2 }
 0xb5a   :  { %2812 = vmatmul.mubr.msk.bf16.vlgmr.msra.gmra.mrb[24].mxu0 %vm376_vm5, %v897_v61 }
 0xb5b   :  { %2823 = vmatprep.mubr.msk.bf16.mxu0 %vm3222_vm0, %v3221_v2  ;;  %2822 = vmatpush3.bf16.msra.mxu0 %v1026_v32  ;;  %v3045_v32 = vld [vmem:[%s3316_s12 + $0x8] sm:$0xff]  }
 0xb5c   :  { %2835 = vmatprep.subr.bf16.mxu0 %v3221_v2 }
 0xc25   :  { %v839_v1 = vpop.f32.mrb[20].mxu0 }
 0xc26   :  { %v2801_v3 = vpop.f32.mrb[21].mxu0 }
 0xc27   :  { %v842_v5 = vpop.f32.mrb[22].mxu0 }
 0xc28   :  { %v846_v6 = vpack.c.bf16 %v842_v5, %v839_v1  ;;  %v2802_v7 = vpop.f32.mrb[23].mxu0 }
 0xc2a   :  { %2806 = vmatmul.mubr.msk.bf16.vlgmr.msra.gmra.mrb[16].mxu1 %vm376_vm5, %v846_v6 }
 0xc2b   :  { %2817 = vmatprep.mubr.msk.bf16.mxu1 %vm3222_vm0, %v3221_v2 }
 0xc2d   :  { %v940_v9 = vpop.f32.mrb[24].mxu0 }
 0xc2e   :  { %v947_v10 = vmul.f32 0.35355338, %v940_v9  ;;  %v2813_v11 = vpop.f32.mrb[25].mxu0 }
 0xc2f   :  { %v943_v12 = vpop.f32.mrb[26].mxu0  ;;  %v3043_v11 = vld [vmem:[%s3306_s30 + $0x8] sm:$0xff]  }
 0xc30   :  { %v948_v13 = vmul.f32 0.35355338, %v943_v12  ;;  %v2814_v14 = vpop.f32.mrb[27].mxu0  ;;  %v949_v15 = vadd.f32 %v947_v10, %v3451_v4  ;;  %v3042_v10 = vld [vmem:[%s3306_s30] sm:$0xff]   ;;  %s3813_s30 = sld [smem:[#allocation8_spill]] }
 0xc32   :  { %v951_v16 = vsel %vm428_vm6, %v949_v15, -inf  ;;  %v950_v17 = vadd.f32 %v948_v13, %v3454_v8 }
 0xc33   :  { %952 = vmax.xlane.f32.xlu1 %v951_v16 }
 0xc34   :  { %v954_v18 = vsel %vm428_vm6, %v950_v17, -inf }
 0xc35   :  { %955 = vmax.xlane.f32.xlu0 %v954_v18 }
 0xcc0   :  { %v953_v19 = vpop.xlane.xlu1 %952 }
 0xcc1   :  { %v957_v20 = vsub.f32 %v949_v15, %v953_v19 }
 0xcc2   :  { %v956_v21 = vpop.xlane.xlu0 %955 }
 0xcc3   :  { %v959_v22 = vmul.f32 1.442695, %v957_v20  ;;  %v958_v23 = vsub.f32 %v950_v17, %v956_v21  ;;  %v2579_v20 = vld [vmem:[%s3296_s19] ss:$0 sm:$0xff]  ;;  %s3811_s19 = sld [smem:[#allocation9_spill]] }
 0xcc5   :  { %3092 = vpow2.f32 %v959_v22  ;;  %v961_v24 = vmul.f32 1.442695, %v958_v23 }
 0xcc7   :  { %3094 = vpow2.f32 %v961_v24  ;;  %v2580_v24 = vld [vmem:[%s3301_s24] ss:$0 sm:$0xff]  ;;  %s3812_s24 = sld [smem:[#allocation7_spill]] }
 0xccf   :  { %v3093_v25 = vpop.eup %3092 }
 0xcd0   :  { %v963_v27 = vsel %vm428_vm6, %v3093_v25, 0.0 }
 0xcd1   :  { %v3095_v28 = vpop.eup %3094  ;;  %964 = vadd.xlane.f32.xlu0 %v963_v27 }
 0xcd2   :  { %v966_v30 = vsel %vm428_vm6, %v3095_v28, 0.0 }
 0xcd3   :  { %967 = vadd.xlane.f32.xlu1 %v966_v30 }
 0xce7   :  { %974 = vrot.lane.b32.xlu0 %v3440_v63, %s3234_s22 }
 0xcfd   :  { %v887_v33 = vpop.f32.mrb[16].mxu1 }
 0xcfe   :  { %v894_v34 = vadd.f32 %v887_v33, %v3510_v26  ;;  %v2807_v35 = vpop.f32.mrb[17].mxu1  ;;  %v3046_v33 = vld [vmem:[%s3316_s12 + $0x10] sm:$0xff]  }
 0xcff   :  { %v890_v36 = vpop.f32.mrb[18].mxu1  ;;  %v3048_v35 = vld [vmem:[%s3316_s12 + $0x20] sm:$0xff]  }
 0xd00   :  { %v895_v37 = vadd.f32 %v890_v36, %v3512_v29  ;;  %v2808_v38 = vpop.f32.mrb[19].mxu1  ;;  %v3049_v36 = vld [vmem:[%s3316_s12 + $0x28] sm:$0xff]  }
 0xd01   :  { %v3051_v38 = vld [vmem:[%s3316_s12 + $0x38] sm:$0xff]  }
 0xd5e   :  { %v965_v39 = vpop.xlane.xlu0 %964 }
 0xd5f   :  { %3096 = vrcp.f32 %v965_v39  ;;  %v2581_v39 = vld [vmem:[%s3809_s8] ss:$0 sm:$0xff] }
 0xd60   :  { %v968_v40 = vpop.xlane.xlu1 %967 }
 0xd61   :  { %3098 = vrcp.f32 %v968_v40 }
 0xd62   :  { %v975_v41 = vpop.permute.xlu0 %974 }
 0xd63   :  { %2816 = vmatpush3.bf16.msra.mxu1 %v975_v41 }
 0xd64   :  { %2827 = vmatprep.subr.bf16.mxu1 %v3221_v2 }
 0xd69   :  { %v3097_v63 = vpop.eup %3096 }
 0xd6a   :  { %v971_v43 = vmul.f32 %v3097_v63, %v3093_v25 }
 0xd6b   :  { %v3099_v42 = vpop.eup %3098 }
 0xd6c   :  { %v972_v44 = vmul.f32 %v3099_v42, %v3095_v28 }
 0xd6e   :  { %v973_v45 = vpack.c.bf16 %v972_v44, %v971_v43 }
 0xd70   :  { %2818 = vmatmul.mubr.msk.bf16.vlgmr.msra.gmra.mrb[20].mxu1 %vm428_vm6, %v973_v45 }
 0xd71   :  { %2831 = vmatprep.mubr.msk.bf16.mxu1 %vm3222_vm0, %v3221_v2  ;;  %2828 = vmatpush3.bf16.msra.mxu1 %v3042_v10 }
 0xd72   :  { %2829 = vmatprep.subr.bf16.mxu1 %v3221_v2 }
 0xd75   :  { %2830 = vmatpush3.bf16.msra.mxu1 %v3043_v11 }
 0xd76   :  { %2855 = vmatprep.subr.bf16.mxu1 %v3221_v2 }
 0xe43   :  { %v1014_v26 = vpop.f32.mrb[20].mxu1 }
 0xe44   :  { %v2819_v29 = vpop.f32.mrb[21].mxu1 }
 0xe45   :  { %v1017_v46 = vpop.f32.mrb[22].mxu1 }
 0xe46   :  { %v1021_v47 = vpack.c.bf16 %v1017_v46, %v1014_v26  ;;  %v2820_v48 = vpop.f32.mrb[23].mxu1 }
 0xe48   :  { %2824 = vmatmul.mubr.msk.bf16.vlgmr.msra.gmra.mrb[28].mxu0 %vm376_vm5, %v1021_v47 }
 0xe49   :  { %2851 = vmatprep.mubr.msk.bf16.mxu0 %vm3222_vm0, %v3221_v2  ;;  %2836 = vmatpush3.bf16.msra.mxu0 %v3044_v31 }
 0xe4a   :  { %2837 = vmatprep.subr.bf16.mxu0 %v3221_v2 }
 0xe4d   :  { %2838 = vmatpush3.bf16.msra.mxu0 %v3045_v32 }
 0xe4e   :  { %2839 = vmatprep.subr.bf16.mxu0 %v3221_v2 }
 0xe51   :  { %2840 = vmatpush3.bf16.msra.mxu0 %v3046_v33  ;;  %v2594_v33 = vld [vmem:[%s3812_s24] ss:$0 sm:$0xff] }
 0xe52   :  { %2841 = vmatprep.subr.bf16.mxu0 %v3221_v2 }
 0xf1b   :  { %v1062_v49 = vpop.f32.mrb[28].mxu0 }
 0xf1c   :  { %v1069_v51 = vadd.f32 %v1062_v49, %v894_v34  ;;  %v2825_v52 = vpop.f32.mrb[29].mxu0  ;;  %v3047_v34 = vld [vmem:[%s3316_s12 + $0x18] sm:$0xff]  }
 0xf1d   :  { %v1065_v53 = vpop.f32.mrb[30].mxu0  ;;  %2842 = vmatpush3.bf16.msra.mxu0 %v3047_v34 }
 0xf1e   :  { %v1070_v54 = vadd.f32 %v1065_v53, %v895_v37  ;;  %v2826_v55 = vpop.f32.mrb[31].mxu0  ;;  %v1078_v56 = vadd.f32 %v2578_v50, %v1069_v51  ;;  %2843 = vmatprep.subr.bf16.mxu0 %v3221_v2  ;;  %v3050_v37 = vld [vmem:[%s3316_s12 + $0x30] sm:$0xff]   ;;  %s3814_s12 = sld [smem:[#allocation10_spill]] }
 0xf20   :  { %v1082_v57 = vsel %vm256_vm4, %v1078_v56, 0.0  ;;  %v1079_v58 = vadd.f32 %v2578_v50, %v1070_v54 }
 0xf21   :  { %1083 = vadd.xlane.f32.xlu1 %v1082_v57  ;;  %2844 = vmatpush3.bf16.msra.mxu0 %v3048_v35 }
 0xf22   :  { %v1085_v59 = vsel %vm256_vm4, %v1079_v58, 0.0  ;;  %2845 = vmatprep.subr.bf16.mxu0 %v3221_v2 }
 0xf25   :  { %1086 = vadd.xlane.f32.xlu1 %v1085_v59  ;;  %2846 = vmatpush3.bf16.msra.mxu0 %v3049_v36 }
 0xf26   :  { %2847 = vmatprep.subr.bf16.mxu0 %v3221_v2 }
 0xf29   :  { %2848 = vmatpush3.bf16.msra.mxu0 %v3050_v37  ;;  %v2595_v37 = vld [vmem:[%s3813_s30] ss:$0 sm:$0xff] }
 0xf2a   :  { %2849 = vmatprep.subr.bf16.mxu0 %v3221_v2 }
 0xf2d   :  { %2850 = vmatpush3.bf16.msra.mxu0 %v3051_v38 }
 0xf2e   :  { %2881 = vmatprep.subr.bf16.mxu0 %v3221_v2 }
 0xfae   :  { %v1084_v60 = vpop.xlane.xlu1 %1083 }
 0xfaf   :  { %v1088_v61 = vmul.f32 0.03125, %v1084_v60 }
 0xfb1   :  { %v1090_v62 = vsub.f32 %v1078_v56, %v1088_v61 }
 0xfb2   :  { %v1087_v0 = vpop.xlane.xlu1 %1086 }
 0xfb3   :  { %v1089_v1 = vmul.f32 0.03125, %v1087_v0  ;;  %v1092_v3 = vmul.f32 %v1090_v62, %v1090_v62 }
 0xfb5   :  { %v1091_v5 = vsub.f32 %v1079_v58, %v1089_v1  ;;  %v1094_v6 = vsel %vm256_vm4, %v1092_v3, 0.0 }
 0xfb6   :  { %1095 = vadd.xlane.f32.xlu1 %v1094_v6 }
 0xfb7   :  { %v1093_v7 = vmul.f32 %v1091_v5, %v1091_v5 }
 0xfb9   :  { %v1097_v9 = vsel %vm256_vm4, %v1093_v7, 0.0 }
 0xfba   :  { %1098 = vadd.xlane.f32.xlu1 %v1097_v9 }
0x1043   :  { %v1096_v12 = vpop.xlane.xlu1 %1095 }
0x1044   :  { %v1100_v13 = vmul.f32 0.03125, %v1096_v12 }
0x1046   :  { %v1102_v14 = vadd.f32 1e-05, %v1100_v13 }
0x1047   :  { %v1099_v15 = vpop.xlane.xlu1 %1098 }
0x1048   :  { %3100 = vrsqrt.f32 %v1102_v14  ;;  %v1101_v16 = vmul.f32 0.03125, %v1099_v15 }
0x104a   :  { %v1103_v17 = vadd.f32 1e-05, %v1101_v16 }
0x104c   :  { %3102 = vrsqrt.f32 %v1103_v17 }
0x1052   :  { %v3101_v18 = vpop.eup %3100 }
0x1053   :  { %v1106_v19 = vmul.f32 %v3101_v18, %v1090_v62  ;;  %v2585_v62 = vld [vmem:[%s3810_s14] ss:$0 sm:$0xff] }
0x1055   :  { %v1114_v22 = vmul.f32 %v2579_v20, %v1106_v19 }
0x1056   :  { %v3103_v21 = vpop.eup %3102 }
0x1057   :  { %v1107_v23 = vmul.f32 %v3103_v21, %v1091_v5  ;;  %v1122_v27 = vadd.f32 %v2580_v24, %v1114_v22  ;;  %v3052_v21 = vld [vmem:[%s3811_s19] sm:$0xff]   ;;  %v3053_v22 = vld [vmem:[%s3811_s19 + $0x8] sm:$0xff]  }
0x1059   :  { %v1115_v25 = vmul.f32 %v2579_v20, %v1107_v23 }
0x105b   :  { %v1123_v28 = vadd.f32 %v2580_v24, %v1115_v25 }
0x105d   :  { %v1128_v30 = vpack.c.bf16 %v1123_v28, %v1122_v27 }
0x105f   :  { %2832 = vmatmul.mubr.msk.bf16.vlgmr.msra.gmra.mrb[24].mxu1 %vm256_vm4, %v1128_v30 }
0x1060   :  { %2859 = vmatprep.mubr.msk.bf16.mxu1 %vm3222_vm0, %v3221_v2  ;;  %2856 = vmatpush3.bf16.msra.mxu1 %v3052_v21 }
0x1061   :  { %2857 = vmatprep.subr.bf16.mxu1 %v3221_v2 }
0x1064   :  { %2858 = vmatpush3.bf16.msra.mxu1 %v3053_v22 }
0x1065   :  { %2863 = vmatprep.subr.bf16.mxu1 %v3221_v2 }
0x1132   :  { %v1185_v40 = vpop.f32.mrb[24].mxu1 }
0x1133   :  { %v1186_v41 = vadd.f32 %v2581_v39, %v1185_v40  ;;  %v2833_v63 = vpop.f32.mrb[25].mxu1 }
0x1134   :  { %v1188_v42 = vpop.f32.mrb[26].mxu1  ;;  %v2596_v63 = vld [vmem:[%s3814_s12] ss:$0 sm:$0xff] }
0x1135   :  { %v1194_v43 = vmul.f32 0.044715, %v1186_v41  ;;  %v1189_v44 = vadd.f32 %v2581_v39, %v1188_v42  ;;  %v2834_v45 = vpop.f32.mrb[27].mxu1  ;;  %v1192_v56 = vmul.f32 0.5, %v1186_v41 }
0x1137   :  { %v1196_v26 = vmul.f32 %v1194_v43, %v1186_v41  ;;  %v1195_v29 = vmul.f32 0.044715, %v1189_v44  ;;  %v1193_v57 = vmul.f32 0.5, %v1189_v44 }
0x1139   :  { %v1198_v46 = vmul.f32 %v1196_v26, %v1186_v41  ;;  %v1197_v47 = vmul.f32 %v1195_v29, %v1189_v44 }
0x113b   :  { %v1200_v48 = vadd.f32 %v1198_v46, %v1186_v41  ;;  %v1199_v49 = vmul.f32 %v1197_v47, %v1189_v44 }
0x113d   :  { %v1202_v50 = vmul.f32 0.7978846, %v1200_v48  ;;  %v1201_v51 = vadd.f32 %v1199_v49, %v1189_v44 }
0x113f   :  { %3104 = vtanh.f32 %v1202_v50  ;;  %v1203_v52 = vmul.f32 0.7978846, %v1201_v51 }
0x1141   :  { %3106 = vtanh.f32 %v1203_v52 }
0x1149   :  { %v3105_v53 = vpop.eup %3104 }
0x114a   :  { %v1206_v54 = vadd.f32 1.0, %v3105_v53 }
0x114b   :  { %v3107_v55 = vpop.eup %3106 }
0x114c   :  { %v1207_v58 = vadd.f32 1.0, %v3107_v55  ;;  %v1208_v59 = vmul.f32 %v1206_v54, %v1192_v56 }
0x114e   :  { %v1209_v60 = vmul.f32 %v1207_v58, %v1193_v57 }
0x1150   :  { %v1226_v61 = vpack.c.bf16 %v1209_v60, %v1208_v59 }
0x1152   :  { %2852 = vmatmul.mubr.bf16.vlgmr.msra.gmra.mrb[32].mxu0 %v1226_v61 }
0x1153   :  { %2883 = vmatprep.mubr.msk.bf16.mxu0 %vm3222_vm0, %v3221_v2 }
0x1225   :  { %v1316_v0 = vpop.f32.mrb[32].mxu0 }
0x1226   :  { %v1317_v1 = vadd.f32 %v2585_v62, %v1316_v0  ;;  %v2853_v3 = vpop.f32.mrb[33].mxu0 }
0x1227   :  { %v1319_v5 = vpop.f32.mrb[34].mxu0 }
0x1228   :  { %v1320_v6 = vadd.f32 %v2585_v62, %v1319_v5  ;;  %v2854_v7 = vpop.f32.mrb[35].mxu0  ;;  %v1325_v9 = vsel %vm256_vm4, %v1317_v1, 0.0 }
0x1229   :  { %1326 = vadd.xlane.f32.xlu1 %v1325_v9 }
0x122a   :  { %v1328_v10 = vsel %vm256_vm4, %v1320_v6, 0.0 }
0x122b   :  { %1329 = vadd.xlane.f32.xlu0 %v1328_v10 }
0x12b6   :  { %v1327_v11 = vpop.xlane.xlu1 %1326 }
0x12b7   :  { %v1331_v12 = vmul.f32 0.03125, %v1327_v11 }
0x12b8   :  { %v1330_v13 = vpop.xlane.xlu0 %1329 }
0x12b9   :  { %v1333_v14 = vsub.f32 %v1317_v1, %v1331_v12  ;;  %v1332_v15 = vmul.f32 0.03125, %v1330_v13 }
0x12bb   :  { %v1334_v16 = vsub.f32 %v1320_v6, %v1332_v15  ;;  %v1335_v17 = vmul.f32 %v1333_v14, %v1333_v14 }
0x12bd   :  { %v1337_v18 = vsel %vm256_vm4, %v1335_v17, 0.0  ;;  %v1336_v19 = vmul.f32 %v1334_v16, %v1334_v16 }
0x12be   :  { %1338 = vadd.xlane.f32.xlu1 %v1337_v18 }
0x12bf   :  { %v1340_v20 = vsel %vm256_vm4, %v1336_v19, 0.0 }
0x12c2   :  { %1341 = vadd.xlane.f32.xlu1 %v1340_v20 }
0x134b   :  { %v1339_v23 = vpop.xlane.xlu1 %1338 }
0x134c   :  { %v1343_v24 = vmul.f32 0.03125, %v1339_v23 }
0x134e   :  { %v1345_v25 = vadd.f32 1e-05, %v1343_v24 }
0x134f   :  { %v1342_v27 = vpop.xlane.xlu1 %1341 }
0x1350   :  { %3108 = vrsqrt.f32 %v1345_v25  ;;  %v1344_v28 = vmul.f32 0.03125, %v1342_v27 }
0x1352   :  { %v1346_v30 = vadd.f32 1e-05, %v1344_v28 }
0x1354   :  { %3110 = vrsqrt.f32 %v1346_v30 }
0x135a   :  { %v3109_v31 = vpop.eup %3108 }
0x135b   :  { %v1349_v32 = vmul.f32 %v3109_v31, %v1333_v14 }
0x135d   :  { %v1357_v35 = vmul.f32 %v2594_v33, %v1349_v32 }
0x135e   :  { %v3111_v34 = vpop.eup %3110 }
0x135f   :  { %v1350_v36 = vmul.f32 %v3111_v34, %v1334_v16  ;;  %v1365_v39 = vadd.f32 %v2595_v37, %v1357_v35 }
0x1361   :  { %v1358_v38 = vmul.f32 %v2594_v33, %v1350_v36 }
0x1363   :  { %v1366_v40 = vadd.f32 %v2595_v37, %v1358_v38 }
0x1365   :  { %v1371_v41 = vpack.c.bf16 %v1366_v40, %v1365_v39 }
0x1367   :  { %2860 = vmatmul.mubr.msk.bf16.vlgmr.msra.gmra.mrb[28].mxu1 %vm256_vm4, %v1371_v41 }
0x1368   :  { %2865 = vmatprep.mubr.msk.bf16.mxu1 %vm3222_vm0, %v3221_v2 }
0x143a   :  { %v1428_v42 = vpop.f32.mrb[28].mxu1 }
0x143b   :  { %v2861_v43 = vpop.f32.mrb[29].mxu1  ;;  %v1429_v45 = vadd.f32 %v2596_v63, %v1428_v42 }
0x143c   :  { %v1431_v44 = vpop.f32.mrb[30].mxu1 }
0x143d   :  { %v1432_v26 = vadd.f32 %v2596_v63, %v1431_v44  ;;  %v2862_v29 = vpop.f32.mrb[31].mxu1  ;;  %v1436_v44 = vld [vmem:[%s3815_s23 + $0x4] sm:$0xf] }
0x143f   :  { %v3609_v46 = vpack.c.bf16 %v1432_v26, %v1429_v45  ;;  %v1695_v45 = vsel %vm629_vm7, %v1436_v44, 0 }
0x1441   :  { %1441 = vrot.lane.b32.xlu1 %v3609_v46, %s3224_s0 }
0x14b3   :  { %v1442_v47 = vpop.permute.xlu1 %1441 }
0x14b4   :  { %v1447_v48 = vsel %vm376_vm5, %v1442_v47, 0 }
0x14b5   :  { %2864 = vmatpush3.bf16.xpose.msra.mxu1 %v1447_v48 }
0x14b6   :  { %2869 = vmatprep.subr.bf16.mxu1 %v3221_v2 }
0x14bc   :  { %2866 = vmatmul.mubr.msk.bf16.vlgmr.msra.gmra.mrb[32].mxu1 %vm376_vm5, %v3609_v46 }
0x14bd   :  { %2871 = vmatprep.mubr.msk.bf16.mxu1 %vm3222_vm0, %v3221_v2 }
0x158f   :  { %v1483_v49 = vpop.f32.mrb[32].mxu1 }
0x1590   :  { %v1490_v50 = vmul.f32 0.35355338, %v1483_v49  ;;  %v2867_v51 = vpop.f32.mrb[33].mxu1 }
0x1591   :  { %v1486_v52 = vpop.f32.mrb[34].mxu1 }
0x1592   :  { %v1491_v53 = vmul.f32 0.35355338, %v1486_v52  ;;  %v2868_v54 = vpop.f32.mrb[35].mxu1  ;;  %v1492_v55 = vadd.f32 %v1490_v50, %v3451_v4  ;;  %v1435_v50 = vld [vmem:[%s3815_s23] sm:$0xf] }
0x1593   :  { %v1742_v54 = vsel %vm629_vm7, %v1435_v50, 0 }
0x1594   :  { %v1494_v56 = vsel %vm428_vm6, %v1492_v55, -inf  ;;  %v1493_v57 = vadd.f32 %v1491_v53, %v3454_v8 }
0x1595   :  { %1495 = vmax.xlane.f32.xlu1 %v1494_v56 }
0x1596   :  { %v1497_v58 = vsel %vm428_vm6, %v1493_v57, -inf }
0x1597   :  { %1498 = vmax.xlane.f32.xlu0 %v1497_v58 }
0x15a6   :  { %1567 = vrot.lane.b32.xlu1 %v3609_v46, %s3225_s5 }
0x1622   :  { %v1496_v59 = vpop.xlane.xlu1 %1495 }
0x1623   :  { %v1500_v60 = vsub.f32 %v1492_v55, %v1496_v59 }
0x1624   :  { %v1499_v61 = vpop.xlane.xlu0 %1498 }
0x1625   :  { %v1502_v62 = vmul.f32 1.442695, %v1500_v60  ;;  %v1501_v0 = vsub.f32 %v1493_v57, %v1499_v61 }
0x1626   :  { %v1568_v16 = vpop.permute.xlu1 %1567 }
0x1627   :  { %3112 = vpow2.f32 %v1502_v62  ;;  %v1504_v1 = vmul.f32 1.442695, %v1501_v0  ;;  %v1573_v18 = vsel %vm376_vm5, %v1568_v16, 0 }
0x1629   :  { %3114 = vpow2.f32 %v1504_v1 }
0x1631   :  { %v3113_v3 = vpop.eup %3112 }
0x1632   :  { %v1506_v5 = vsel %vm428_vm6, %v3113_v3, 0.0 }
0x1633   :  { %v3115_v6 = vpop.eup %3114  ;;  %1507 = vadd.xlane.f32.xlu0 %v1506_v5 }
0x1634   :  { %v1509_v7 = vsel %vm428_vm6, %v3115_v6, 0.0 }
0x1637   :  { %1510 = vadd.xlane.f32.xlu0 %v1509_v7 }
0x164d   :  { %1517 = vrot.lane.b32.xlu0 %v3609_v46, %s3226_s13 }
0x1651   :  { %1565 = vrot.lane.b32.xlu0 %v3609_v46, %s3227_s21 }
0x16c0   :  { %v1508_v9 = vpop.xlane.xlu0 %1507 }
0x16c1   :  { %3116 = vrcp.f32 %v1508_v9 }
0x16c4   :  { %v1511_v10 = vpop.xlane.xlu0 %1510 }
0x16c5   :  { %3118 = vrcp.f32 %v1511_v10 }
0x16c8   :  { %v1518_v11 = vpop.permute.xlu0 %1517 }
0x16c9   :  { %2870 = vmatpush3.bf16.msra.mxu1 %v1518_v11 }
0x16ca   :  { %2875 = vmatprep.subr.bf16.mxu1 %v3221_v2 }
0x16cb   :  { %v3117_v12 = vpop.eup %3116 }
0x16cc   :  { %v1514_v14 = vmul.f32 %v3117_v12, %v3113_v3  ;;  %v1566_v19 = vpop.permute.xlu0 %1565 }
0x16cf   :  { %v3119_v13 = vpop.eup %3118 }
0x16d0   :  { %v1515_v15 = vmul.f32 %v3119_v13, %v3115_v6 }
0x16d2   :  { %v1516_v17 = vpack.c.bf16 %v1515_v15, %v1514_v14 }
0x16d4   :  { %2872 = vmatmul.mubr.msk.bf16.vlgmr.msra.gmra.mrb[36].mxu1 %vm428_vm6, %v1516_v17 }
0x16d5   :  { %2876 = vmatpush3.bf16.xpose.msra.mxu1 %v1573_v18  ;;  %2877 = vmatprep.mubr.msk.bf16.mxu1 %vm3222_vm0, %v3221_v2 }
0x16d6   :  { %2887 = vmatprep.subr.bf16.mxu1 %v3221_v2 }
0x16dc   :  { %2878 = vmatmul.mubr.msk.bf16.vlgmr.msra.gmra.mrb[40].mxu1 %vm376_vm5, %v1566_v19  ;;  %v3678_v19 = vld [vmem:[%s3261_s17] sm:$0xff] }
0x16dd   :  { %2889 = vmatprep.mubr.msk.bf16.mxu1 %vm3222_vm0, %v3221_v2  ;;  %2888 = vmatpush3.bf16.msra.mxu1 %v1695_v45  ;;  %v1437_v45 = vld [vmem:[%s3815_s23 + $0x8] sm:$0xf] }
0x16de   :  { %2899 = vmatprep.subr.bf16.mxu1 %v3221_v2 }
0x17a7   :  { %v1557_v20 = vpop.f32.mrb[36].mxu1 }
0x17a8   :  { %v2873_v21 = vpop.f32.mrb[37].mxu1 }
0x17a9   :  { %v1560_v22 = vpop.f32.mrb[38].mxu1 }
0x17aa   :  { %v1564_v23 = vpack.c.bf16 %v1560_v22, %v1557_v20  ;;  %v2874_v24 = vpop.f32.mrb[39].mxu1  ;;  %v3157_v22 = vld [vmem:[%s3261_s17 + $0x8] sm:$0xff]  ;;  %s3816_s17 = sld [smem:[#allocation12_spill]] }
0x17af   :  { %v1609_v25 = vpop.f32.mrb[40].mxu1 }
0x17b0   :  { %v1616_v27 = vmul.f32 0.35355338, %v1609_v25  ;;  %v2879_v28 = vpop.f32.mrb[41].mxu1 }
0x17b1   :  { %v1612_v30 = vpop.f32.mrb[42].mxu1 }
0x17b2   :  { %v1617_v31 = vmul.f32 0.35355338, %v1612_v30  ;;  %v2880_v32 = vpop.f32.mrb[43].mxu1  ;;  %v1618_v33 = vadd.f32 %v1616_v27, %v3451_v4 }
0x17b4   :  { %v1620_v34 = vsel %vm428_vm6, %v1618_v33, -inf  ;;  %v1619_v35 = vadd.f32 %v1617_v31, %v3454_v8 }
0x17b5   :  { %1621 = vmax.xlane.f32.xlu0 %v1620_v34 }
0x17b6   :  { %v1623_v36 = vsel %vm428_vm6, %v1619_v35, -inf }
0x17b7   :  { %1624 = vmax.xlane.f32.xlu1 %v1623_v36 }
0x17c8   :  { %1787 = vrot.lane.b32.xlu1 %v3609_v46, %s3228_s25 }
0x1842   :  { %v1622_v37 = vpop.xlane.xlu0 %1621 }
0x1843   :  { %v1626_v38 = vsub.f32 %v1618_v33, %v1622_v37 }
0x1844   :  { %v1625_v39 = vpop.xlane.xlu1 %1624 }
0x1845   :  { %v1628_v40 = vmul.f32 1.442695, %v1626_v38  ;;  %v1627_v41 = vsub.f32 %v1619_v35, %v1625_v39 }
0x1847   :  { %3120 = vpow2.f32 %v1628_v40  ;;  %v1630_v63 = vmul.f32 1.442695, %v1627_v41 }
0x1848   :  { %v1788_v57 = vpop.permute.xlu1 %1787 }
0x1849   :  { %3122 = vpow2.f32 %v1630_v63  ;;  %v1793_v61 = vsel %vm376_vm5, %v1788_v57, 0 }
0x1851   :  { %v3121_v4 = vpop.eup %3120 }
0x1852   :  { %v1632_v42 = vsel %vm428_vm6, %v3121_v4, 0.0 }
0x1853   :  { %v3123_v8 = vpop.eup %3122  ;;  %1633 = vadd.xlane.f32.xlu0 %v1632_v42 }
0x1854   :  { %v1635_v43 = vsel %vm428_vm6, %v3123_v8, 0.0 }
0x1857   :  { %1636 = vadd.xlane.f32.xlu0 %v1635_v43 }
0x186d   :  { %1643 = vrot.lane.b32.xlu0 %v3609_v46, %s3230_s3 }
0x1871   :  { %1785 = vrot.lane.b32.xlu0 %v3609_v46, %s3229_s29 }
0x18e0   :  { %v1634_v26 = vpop.xlane.xlu0 %1633 }
0x18e1   :  { %3124 = vrcp.f32 %v1634_v26  ;;  %v1915_v26 = vsel %vm629_vm7, %v1437_v45, 0 }
0x18e4   :  { %v1637_v29 = vpop.xlane.xlu0 %1636 }
0x18e5   :  { %3126 = vrcp.f32 %v1637_v29 }
0x18e8   :  { %v1644_v47 = vpop.permute.xlu0 %1643 }
0x18e9   :  { %2882 = vmatpush3.bf16.msra.mxu0 %v1644_v47 }
0x18ea   :  { %2893 = vmatprep.subr.bf16.mxu0 %v3221_v2 }
0x18eb   :  { %v3125_v48 = vpop.eup %3124 }
0x18ec   :  { %v1640_v51 = vmul.f32 %v3125_v48, %v3121_v4  ;;  %v1786_v5 = vpop.permute.xlu0 %1785 }
0x18ef   :  { %v3127_v49 = vpop.eup %3126 }
0x18f0   :  { %v1641_v52 = vmul.f32 %v3127_v49, %v3123_v8 }
0x18f2   :  { %v1642_v53 = vpack.c.bf16 %v1641_v52, %v1640_v51 }
0x18f4   :  { %2884 = vmatmul.mubr.msk.bf16.vlgmr.msra.gmra.mrb[36].mxu0 %vm428_vm6, %v1642_v53 }
0x18f5   :  { %2894 = vmatpush3.bf16.msra.mxu0 %v1742_v54  ;;  %2895 = vmatprep.mubr.msk.bf16.mxu0 %vm3222_vm0, %v3221_v2 }
0x18f6   :  { %2905 = vmatprep.subr.bf16.mxu0 %v3221_v2 }
0x18fc   :  { %2896 = vmatmul.mubr.msk.bf16.vlgmr.msra.gmra.mrb[40].mxu0 %vm376_vm5, %v1564_v23 }
0x18fd   :  { %2907 = vmatprep.mubr.msk.bf16.mxu0 %vm3222_vm0, %v3221_v2 }
0x19c7   :  { %v1683_v55 = vpop.f32.mrb[36].mxu0 }
0x19c8   :  { %v2885_v56 = vpop.f32.mrb[37].mxu0 }
0x19c9   :  { %v1686_v58 = vpop.f32.mrb[38].mxu0 }
0x19ca   :  { %v1690_v59 = vpack.c.bf16 %v1686_v58, %v1683_v55  ;;  %v2886_v60 = vpop.f32.mrb[39].mxu0 }
0x19cc   :  { %2890 = vmatmul.mubr.msk.bf16.vlgmr.msra.gmra.mrb[44].mxu1 %vm376_vm5, %v1690_v59 }
0x19cd   :  { %2900 = vmatpush3.bf16.xpose.msra.mxu1 %v1793_v61  ;;  %2901 = vmatprep.mubr.msk.bf16.mxu1 %vm3222_vm0, %v3221_v2 }
0x19ce   :  { %2911 = vmatprep.subr.bf16.mxu1 %v3221_v2 }
0x19cf   :  { %v1778_v62 = vpop.f32.mrb[40].mxu0 }
0x19d0   :  { %v2897_v0 = vpop.f32.mrb[41].mxu0 }
0x19d1   :  { %v1781_v1 = vpop.f32.mrb[42].mxu0 }
0x19d2   :  { %v2898_v3 = vpop.f32.mrb[43].mxu0 }
0x19d4   :  { %2902 = vmatmul.mubr.msk.bf16.vlgmr.msra.gmra.mrb[48].mxu1 %vm376_vm5, %v1786_v5 }
0x19d5   :  { %2913 = vmatprep.mubr.msk.bf16.mxu1 %vm3222_vm0, %v3221_v2  ;;  %2912 = vmatpush3.bf16.msra.mxu1 %v1915_v26 }
0x19d6   :  { %2923 = vmatprep.subr.bf16.mxu1 %v3221_v2 }
0x1a9f   :  { %v1731_v6 = vpop.f32.mrb[44].mxu1 }
0x1aa0   :  { %v3673_v7 = vadd.f32 %v1778_v62, %v1731_v6  ;;  %v2891_v9 = vpop.f32.mrb[45].mxu1 }
0x1aa1   :  { %v1734_v10 = vpop.f32.mrb[46].mxu1 }
0x1aa2   :  { %v3675_v11 = vadd.f32 %v1781_v1, %v1734_v10  ;;  %v2892_v12 = vpop.f32.mrb[47].mxu1 }
0x1aa7   :  { %v1829_v13 = vpop.f32.mrb[48].mxu1 }
0x1aa8   :  { %v1836_v14 = vmul.f32 0.35355338, %v1829_v13  ;;  %v2903_v15 = vpop.f32.mrb[49].mxu1  ;;  %v1438_v13 = vld [vmem:[%s3815_s23 + $0xc] sm:$0xf] }
0x1aa9   :  { %v1832_v16 = vpop.f32.mrb[50].mxu1 }
0x1aaa   :  { %v1837_v17 = vmul.f32 0.35355338, %v1832_v16  ;;  %v2904_v18 = vpop.f32.mrb[51].mxu1  ;;  %v1838_v20 = vadd.f32 %v3678_v19, %v1836_v14  ;;  %v2090_v14 = vsel %vm629_vm7, %v1438_v13, 0  ;;  %v3059_v13 = vld [vmem:[%s3820_s2 + $0x18] sm:$0xff]  }
0x1aac   :  { %v1840_v21 = vsel %vm428_vm6, %v1838_v20, -inf  ;;  %v1839_v23 = vadd.f32 %v3157_v22, %v1837_v17 }
0x1aad   :  { %1841 = vmax.xlane.f32.xlu1 %v1840_v21 }
0x1aae   :  { %v1843_v24 = vsel %vm428_vm6, %v1839_v23, -inf }
0x1aaf   :  { %1844 = vmax.xlane.f32.xlu0 %v1843_v24 }
0x1b3a   :  { %v1842_v25 = vpop.xlane.xlu1 %1841 }
0x1b3b   :  { %v1846_v27 = vsub.f32 %v1838_v20, %v1842_v25 }
0x1b3c   :  { %v1845_v28 = vpop.xlane.xlu0 %1844 }
0x1b3d   :  { %v1848_v30 = vmul.f32 1.442695, %v1846_v27  ;;  %v1847_v31 = vsub.f32 %v1839_v23, %v1845_v28 }
0x1b3f   :  { %3128 = vpow2.f32 %v1848_v30  ;;  %v1850_v32 = vmul.f32 1.442695, %v1847_v31 }
0x1b41   :  { %3130 = vpow2.f32 %v1850_v32 }
0x1b49   :  { %v3129_v33 = vpop.eup %3128 }
0x1b4a   :  { %v1852_v34 = vsel %vm428_vm6, %v3129_v33, 0.0 }
0x1b4b   :  { %v3131_v35 = vpop.eup %3130  ;;  %1853 = vadd.xlane.f32.xlu0 %v1852_v34  ;;  %v2612_v34 = vld [vmem:[%s3816_s17] ss:$0 sm:$0xff] }
0x1b4c   :  { %v1855_v36 = vsel %vm428_vm6, %v3131_v35, 0.0 }
0x1b4d   :  { %1856 = vadd.xlane.f32.xlu1 %v1855_v36 }
0x1b5e   :  { %1962 = vrot.lane.b32.xlu1 %v3609_v46, %s3233_s18 }
0x1b61   :  { %1863 = vrot.lane.b32.xlu0 %v3609_v46, %s3231_s15 }
0x1b62   :  { %1960 = vrot.lane.b32.xlu1 %v3609_v46, %s3232_s16 }
0x1bd8   :  { %v1854_v37 = vpop.xlane.xlu0 %1853 }
0x1bd9   :  { %3132 = vrcp.f32 %v1854_v37 }
0x1bda   :  { %v1857_v38 = vpop.xlane.xlu1 %1856 }
0x1bdb   :  { %3134 = vrcp.f32 %v1857_v38 }
0x1bdc   :  { %v1864_v39 = vpop.permute.xlu0 %1863 }
0x1bdd   :  { %2906 = vmatpush3.bf16.msra.mxu0 %v1864_v39 }
0x1bde   :  { %2917 = vmatprep.subr.bf16.mxu0 %v3221_v2  ;;  %v1963_v42 = vpop.permute.xlu1 %1962 }
0x1bdf   :  { %v1968_v43 = vsel %vm376_vm5, %v1963_v42, 0 }
0x1be2   :  { %v1961_v44 = vpop.permute.xlu1 %1960 }
0x1be3   :  { %v3133_v40 = vpop.eup %3132 }
0x1be4   :  { %v1860_v63 = vmul.f32 %v3133_v40, %v3129_v33 }
0x1be5   :  { %v3135_v41 = vpop.eup %3134 }
0x1be6   :  { %v1861_v4 = vmul.f32 %v3135_v41, %v3131_v35 }
0x1be8   :  { %v1862_v8 = vpack.c.bf16 %v1861_v4, %v1860_v63 }
0x1bea   :  { %2908 = vmatmul.mubr.msk.bf16.vlgmr.msra.gmra.mrb[44].mxu0 %vm428_vm6, %v1862_v8 }
0x1beb   :  { %2918 = vmatpush3.bf16.xpose.msra.mxu0 %v1968_v43  ;;  %2919 = vmatprep.mubr.msk.bf16.mxu0 %vm3222_vm0, %v3221_v2 }
0x1bec   :  { %2929 = vmatprep.subr.bf16.mxu0 %v3221_v2 }
0x1bf2   :  { %2920 = vmatmul.mubr.msk.bf16.vlgmr.msra.gmra.mrb[48].mxu0 %vm376_vm5, %v1961_v44 }
0x1bf3   :  { %2931 = vmatprep.mubr.msk.bf16.mxu0 %vm3222_vm0, %v3221_v2  ;;  %2930 = vmatpush3.bf16.msra.mxu0 %v2090_v14  ;;  %v3060_v14 = vld [vmem:[%s3820_s2 + $0x20] sm:$0xff]  }
0x1bf4   :  { %2943 = vmatprep.subr.bf16.mxu0 %v3221_v2 }
0x1cbd   :  { %v1903_v29 = vpop.f32.mrb[44].mxu0 }
0x1cbe   :  { %v2909_v47 = vpop.f32.mrb[45].mxu0 }
0x1cbf   :  { %v1906_v48 = vpop.f32.mrb[46].mxu0 }
0x1cc0   :  { %v1910_v49 = vpack.c.bf16 %v1906_v48, %v1903_v29  ;;  %v2910_v50 = vpop.f32.mrb[47].mxu0 }
0x1cc1   :  { %v3054_v50 = vld [vmem:[%s3817_s26] sm:$0xff]  }
0x1cc2   :  { %2914 = vmatmul.mubr.msk.bf16.vlgmr.msra.gmra.mrb[52].mxu1 %vm376_vm5, %v1910_v49 }
0x1cc3   :  { %2925 = vmatprep.mubr.msk.bf16.mxu1 %vm3222_vm0, %v3221_v2 }
0x1cc5   :  { %v2004_v51 = vpop.f32.mrb[48].mxu0 }
0x1cc6   :  { %v2011_v52 = vmul.f32 0.35355338, %v2004_v51  ;;  %v2921_v53 = vpop.f32.mrb[49].mxu0  ;;  %v3055_v51 = vld [vmem:[%s3817_s26 + $0x8] sm:$0xff]  }
0x1cc7   :  { %v2007_v54 = vpop.f32.mrb[50].mxu0 }
0x1cc8   :  { %v2012_v55 = vmul.f32 0.35355338, %v2007_v54  ;;  %v2922_v56 = vpop.f32.mrb[51].mxu0  ;;  %v2013_v57 = vadd.f32 %v3678_v19, %v2011_v52 }
0x1cca   :  { %v2015_v58 = vsel %vm428_vm6, %v2013_v57, -inf  ;;  %v2014_v59 = vadd.f32 %v3157_v22, %v2012_v55 }
0x1ccb   :  { %2016 = vmax.xlane.f32.xlu0 %v2015_v58 }
0x1ccc   :  { %v2018_v60 = vsel %vm428_vm6, %v2014_v59, -inf }
0x1ccd   :  { %2019 = vmax.xlane.f32.xlu1 %v2018_v60  ;;  %v2613_v60 = vld [vmem:[%s3818_s28] ss:$0 sm:$0xff] }
0x1cde   :  { %2038 = vrot.lane.b32.xlu1 %v3609_v46, %s3234_s22 }
0x1d58   :  { %v2017_v61 = vpop.xlane.xlu0 %2016 }
0x1d59   :  { %v2021_v62 = vsub.f32 %v2013_v57, %v2017_v61 }
0x1d5a   :  { %v2020_v0 = vpop.xlane.xlu1 %2019 }
0x1d5b   :  { %v2023_v1 = vmul.f32 1.442695, %v2021_v62  ;;  %v2022_v3 = vsub.f32 %v2014_v59, %v2020_v0 }
0x1d5d   :  { %3136 = vpow2.f32 %v2023_v1  ;;  %v2025_v5 = vmul.f32 1.442695, %v2022_v3  ;;  %v2614_v1 = vld [vmem:[%s3819_s1] ss:$0 sm:$0xff] }
0x1d5e   :  { %v2039_v6 = vpop.permute.xlu1 %2038 }
0x1d5f   :  { %3138 = vpow2.f32 %v2025_v5  ;;  %2924 = vmatpush3.bf16.msra.mxu1 %v2039_v6 }
0x1d60   :  { %2935 = vmatprep.subr.bf16.mxu1 %v3221_v2 }
0x1d67   :  { %v3137_v9 = vpop.eup %3136 }
0x1d68   :  { %v2027_v10 = vsel %vm428_vm6, %v3137_v9, 0.0 }
0x1d69   :  { %v3139_v12 = vpop.eup %3138  ;;  %2028 = vadd.xlane.f32.xlu0 %v2027_v10  ;;  %v3056_v10 = vld [vmem:[%s3820_s2] sm:$0xff]  }
0x1d6a   :  { %v2030_v46 = vsel %vm428_vm6, %v3139_v12, 0.0 }
0x1d6d   :  { %2031 = vadd.xlane.f32.xlu0 %v2030_v46  ;;  %v3058_v46 = vld [vmem:[%s3820_s2 + $0x10] sm:$0xff]  }
0x1d95   :  { %v1951_v15 = vpop.f32.mrb[52].mxu1 }
0x1d96   :  { %v1958_v16 = vadd.f32 %v1951_v15, %v3673_v7  ;;  %v2915_v17 = vpop.f32.mrb[53].mxu1  ;;  %v3061_v15 = vld [vmem:[%s3820_s2 + $0x28] sm:$0xff]  }
0x1d97   :  { %v1954_v18 = vpop.f32.mrb[54].mxu1  ;;  %v3063_v17 = vld [vmem:[%s3820_s2 + $0x38] sm:$0xff]  }
0x1d98   :  { %v1959_v19 = vadd.f32 %v1954_v18, %v3675_v11  ;;  %v2916_v20 = vpop.f32.mrb[55].mxu1  ;;  %v2615_v18 = vld [vmem:[%s3821_s7] ss:$0 sm:$0xff] }
0x1df6   :  { %v2029_v21 = vpop.xlane.xlu0 %2028 }
0x1df7   :  { %3140 = vrcp.f32 %v2029_v21 }
0x1dfa   :  { %v2032_v22 = vpop.xlane.xlu0 %2031 }
0x1dfb   :  { %3142 = vrcp.f32 %v2032_v22 }
0x1e01   :  { %v3141_v23 = vpop.eup %3140 }
0x1e02   :  { %v2035_v25 = vmul.f32 %v3141_v23, %v3137_v9 }
0x1e05   :  { %v3143_v24 = vpop.eup %3142 }
0x1e06   :  { %v2036_v27 = vmul.f32 %v3143_v24, %v3139_v12  ;;  %v3057_v12 = vld [vmem:[%s3820_s2 + $0x8] sm:$0xff]  }
0x1e08   :  { %v2037_v28 = vpack.c.bf16 %v2036_v27, %v2035_v25 }
0x1e0a   :  { %2926 = vmatmul.mubr.msk.bf16.vlgmr.msra.gmra.mrb[56].mxu1 %vm428_vm6, %v2037_v28 }
0x1e0b   :  { %2939 = vmatprep.mubr.msk.bf16.mxu1 %vm3222_vm0, %v3221_v2  ;;  %2936 = vmatpush3.bf16.msra.mxu1 %v3054_v50 }
0x1e0c   :  { %2937 = vmatprep.subr.bf16.mxu1 %v3221_v2 }
0x1e0f   :  { %2938 = vmatpush3.bf16.msra.mxu1 %v3055_v51  ;;  %v3159_v51 = vld [vmem:[%s3251_s9 + $0x8] sm:$0xff]  }
0x1e10   :  { %2963 = vmatprep.subr.bf16.mxu1 %v3221_v2 }
0x1edd   :  { %v2078_v7 = vpop.f32.mrb[56].mxu1 }
0x1ede   :  { %v2927_v30 = vpop.f32.mrb[57].mxu1 }
0x1edf   :  { %v2081_v31 = vpop.f32.mrb[58].mxu1 }
0x1ee0   :  { %v2085_v11 = vpack.c.bf16 %v2081_v31, %v2078_v7  ;;  %v2928_v32 = vpop.f32.mrb[59].mxu1 }
0x1ee2   :  { %2932 = vmatmul.mubr.msk.bf16.vlgmr.msra.gmra.mrb[52].mxu0 %vm376_vm5, %v2085_v11 }
0x1ee3   :  { %2959 = vmatprep.mubr.msk.bf16.mxu0 %vm3222_vm0, %v3221_v2  ;;  %2944 = vmatpush3.bf16.msra.mxu0 %v3056_v10  ;;  %v3163_v10 = vld [vmem:[%s3251_s9 + $0x28] sm:$0xff]  }
0x1ee4   :  { %2945 = vmatprep.subr.bf16.mxu0 %v3221_v2 }
0x1ee7   :  { %2946 = vmatpush3.bf16.msra.mxu0 %v3057_v12  ;;  %v2451_v12 = vsel %vm256_vm4, %v3163_v10, 0 }
0x1ee8   :  { %2947 = vmatprep.subr.bf16.mxu0 %v3221_v2 }
0x1eeb   :  { %2948 = vmatpush3.bf16.msra.mxu0 %v3058_v46  ;;  %v3164_v46 = vld [vmem:[%s3251_s9 + $0x30] sm:$0xff]  }
0x1eec   :  { %2949 = vmatprep.subr.bf16.mxu0 %v3221_v2 }
0x1eef   :  { %2950 = vmatpush3.bf16.msra.mxu0 %v3059_v13  ;;  %v2454_v13 = vsel %vm256_vm4, %v3164_v46, 0 }
0x1ef0   :  { %2951 = vmatprep.subr.bf16.mxu0 %v3221_v2 }
0x1ef3   :  { %2952 = vmatpush3.bf16.msra.mxu0 %v3060_v14  ;;  %v3165_v14 = vld [vmem:[%s3251_s9 + $0x38] sm:$0xff]  }
0x1ef4   :  { %2953 = vmatprep.subr.bf16.mxu0 %v3221_v2 }
0x1ef7   :  { %2954 = vmatpush3.bf16.msra.mxu0 %v3061_v15  ;;  %v2457_v15 = vsel %vm256_vm4, %v3165_v14, 0 }
0x1ef8   :  { %2955 = vmatprep.subr.bf16.mxu0 %v3221_v2 }
0x1fb5   :  { %v2126_v33 = vpop.f32.mrb[52].mxu0 }
0x1fb6   :  { %v2133_v35 = vadd.f32 %v2126_v33, %v1958_v16  ;;  %v2933_v36 = vpop.f32.mrb[53].mxu0  ;;  %v3062_v16 = vld [vmem:[%s3820_s2 + $0x30] sm:$0xff]  }
0x1fb7   :  { %v2129_v37 = vpop.f32.mrb[54].mxu0  ;;  %2956 = vmatpush3.bf16.msra.mxu0 %v3062_v16 }
0x1fb8   :  { %v2134_v38 = vadd.f32 %v2129_v37, %v1959_v19  ;;  %v2934_v39 = vpop.f32.mrb[55].mxu0  ;;  %v2142_v40 = vadd.f32 %v2612_v34, %v2133_v35  ;;  %2957 = vmatprep.subr.bf16.mxu0 %v3221_v2 }
0x1fba   :  { %v2146_v41 = vsel %vm256_vm4, %v2142_v40, 0.0  ;;  %v2143_v63 = vadd.f32 %v2612_v34, %v2134_v38 }
0x1fbb   :  { %2147 = vadd.xlane.f32.xlu0 %v2146_v41  ;;  %2958 = vmatpush3.bf16.msra.mxu0 %v3063_v17 }
0x1fbc   :  { %v2149_v4 = vsel %vm256_vm4, %v2143_v63, 0.0 }
0x1fbf   :  { %2150 = vadd.xlane.f32.xlu0 %v2149_v4 }
0x2048   :  { %v2148_v42 = vpop.xlane.xlu0 %2147 }
0x2049   :  { %v2152_v8 = vmul.f32 0.03125, %v2148_v42  ;;  %v2619_v42 = vld [vmem:[%s3381_s20] ss:$0 sm:$0xff] }
0x204b   :  { %v2154_v43 = vsub.f32 %v2142_v40, %v2152_v8 }
0x204c   :  { %v2151_v44 = vpop.xlane.xlu0 %2150 }
0x204d   :  { %v2153_v45 = vmul.f32 0.03125, %v2151_v44  ;;  %v2156_v26 = vmul.f32 %v2154_v43, %v2154_v43 }
0x204f   :  { %v2155_v29 = vsub.f32 %v2143_v63, %v2153_v45  ;;  %v2158_v47 = vsel %vm256_vm4, %v2156_v26, 0.0 }
0x2050   :  { %2159 = vadd.xlane.f32.xlu0 %v2158_v47 }
0x2051   :  { %v2157_v48 = vmul.f32 %v2155_v29, %v2155_v29 }
0x2053   :  { %v2161_v49 = vsel %vm256_vm4, %v2157_v48, 0.0 }
0x2054   :  { %2162 = vadd.xlane.f32.xlu0 %v2161_v49  ;;  %v3158_v49 = vld [vmem:[%s3251_s9] sm:$0xff]  }
0x2055   :  { %v2436_v50 = vsel %vm256_vm4, %v3158_v49, 0 }
0x20dd   :  { %v2160_v52 = vpop.xlane.xlu0 %2159 }
0x20de   :  { %v2164_v53 = vmul.f32 0.03125, %v2160_v52  ;;  %v2439_v52 = vsel %vm256_vm4, %v3159_v51, 0 }
0x20e0   :  { %v2166_v54 = vadd.f32 1e-05, %v2164_v53  ;;  %v3160_v53 = vld [vmem:[%s3251_s9 + $0x10] sm:$0xff]  }
0x20e1   :  { %v2163_v55 = vpop.xlane.xlu0 %2162 }
0x20e2   :  { %3144 = vrsqrt.f32 %v2166_v54  ;;  %v2165_v56 = vmul.f32 0.03125, %v2163_v55  ;;  %v2442_v54 = vsel %vm256_vm4, %v3160_v53, 0  ;;  %v3161_v55 = vld [vmem:[%s3251_s9 + $0x18] sm:$0xff]  }
0x20e4   :  { %v2167_v57 = vadd.f32 1e-05, %v2165_v56  ;;  %v2445_v56 = vsel %vm256_vm4, %v3161_v55, 0 }
0x20e6   :  { %3146 = vrsqrt.f32 %v2167_v57  ;;  %v3162_v57 = vld [vmem:[%s3251_s9 + $0x20] sm:$0xff]   ;;  %s3235_s9 = smov [#allocation2]  }
0x20e7   :  { %s2507_s20 = sshll.u32 %s3235_s9, 4  ;;  %s2508_s20 = int_to_ptr.vmem [resolvable:$true] %s2507_s20 }
0x20e8   :  { %p3171_p1 = scmp.lt.s32.totalorder %s2508_s20, %s2508_s20 }
0x20ec   :  { %v3145_v58 = vpop.eup %3144 }
0x20ed   :  { %v2170_v59 = vmul.f32 %v3145_v58, %v2154_v43  ;;  %v2448_v58 = vsel %vm256_vm4, %v3162_v57, 0 }
0x20ef   :  { %v2178_v62 = vmul.f32 %v2613_v60, %v2170_v59 }
0x20f0   :  { %v3147_v61 = vpop.eup %3146 }
0x20f1   :  { %v2171_v0 = vmul.f32 %v3147_v61, %v2155_v29  ;;  %v2186_v5 = vadd.f32 %v2614_v1, %v2178_v62 }
0x20f3   :  { %v2179_v3 = vmul.f32 %v2613_v60, %v2171_v0 }
0x20f5   :  { %v2187_v6 = vadd.f32 %v2614_v1, %v2179_v3 }
0x20f7   :  { %v2192_v9 = vpack.c.bf16 %v2187_v6, %v2186_v5 }
0x20f9   :  { %2940 = vmatmul.mubr.msk.bf16.vlgmr.msra.gmra.mrb[60].mxu1 %vm256_vm4, %v2192_v9 }
0x20fa   :  { %2979 = vmatprep.mubr.msk.bf16.mxu1 %vm3222_vm0, %v3221_v2  ;;  %2964 = vmatpush3.bf16.xpose.msra.mxu1 %v2436_v50 }
0x20fb   :  { %2965 = vmatprep.subr.bf16.mxu1 %v3221_v2 }
0x2102   :  { %2966 = vmatpush3.bf16.xpose.msra.mxu1 %v2439_v52 }
0x2103   :  { %2967 = vmatprep.subr.bf16.mxu1 %v3221_v2 }
0x210a   :  { %2968 = vmatpush3.bf16.xpose.msra.mxu1 %v2442_v54 }
0x210b   :  { %2969 = vmatprep.subr.bf16.mxu1 %v3221_v2 }
0x2112   :  { %2970 = vmatpush3.bf16.xpose.msra.mxu1 %v2445_v56 }
0x2113   :  { %2971 = vmatprep.subr.bf16.mxu1 %v3221_v2 }
0x211a   :  { %2972 = vmatpush3.bf16.xpose.msra.mxu1 %v2448_v58 }
0x211b   :  { %2973 = vmatprep.subr.bf16.mxu1 %v3221_v2 }
0x2122   :  { %2974 = vmatpush3.bf16.xpose.msra.mxu1 %v2451_v12 }
0x2123   :  { %2975 = vmatprep.subr.bf16.mxu1 %v3221_v2 }
0x212a   :  { %2976 = vmatpush3.bf16.xpose.msra.mxu1 %v2454_v13 }
0x212b   :  { %2977 = vmatprep.subr.bf16.mxu1 %v3221_v2  ;;  %v2629_v2 = vld [vmem:[%s3391_s4] ss:$0 sm:$0xff] }
0x2132   :  { %2978 = vmatpush3.bf16.xpose.msra.mxu1 %v2457_v15 }
0x21cc   :  { %v2249_v19 = vpop.f32.mrb[60].mxu1 }
0x21cd   :  { %v2250_v20 = vadd.f32 %v2615_v18, %v2249_v19  ;;  %v2941_v21 = vpop.f32.mrb[61].mxu1 }
0x21ce   :  { %v2252_v22 = vpop.f32.mrb[62].mxu1 }
0x21cf   :  { %v2258_v23 = vmul.f32 0.044715, %v2250_v20  ;;  %v2253_v24 = vadd.f32 %v2615_v18, %v2252_v22  ;;  %v2942_v25 = vpop.f32.mrb[63].mxu1  ;;  %v2256_v38 = vmul.f32 0.5, %v2250_v20 }
0x21d1   :  { %v2260_v27 = vmul.f32 %v2258_v23, %v2250_v20  ;;  %v2259_v28 = vmul.f32 0.044715, %v2253_v24  ;;  %v2257_v39 = vmul.f32 0.5, %v2253_v24 }
0x21d3   :  { %v2262_v7 = vmul.f32 %v2260_v27, %v2250_v20  ;;  %v2261_v30 = vmul.f32 %v2259_v28, %v2253_v24 }
0x21d5   :  { %v2264_v31 = vadd.f32 %v2262_v7, %v2250_v20  ;;  %v2263_v11 = vmul.f32 %v2261_v30, %v2253_v24 }
0x21d7   :  { %v2266_v32 = vmul.f32 0.7978846, %v2264_v31  ;;  %v2265_v33 = vadd.f32 %v2263_v11, %v2253_v24  ;;  %v2628_v24 = vld [vmem:[%s3386_s27] ss:$0 sm:$0xff]  ;;  %s3166_s27 = scalar_lea.vmem %s2508_s20, 256 }
0x21d8   :  { %p3167_p0 = scmp.ne.s32.totalorder %s2508_s20, %s3166_s27  ;;  %p3172_p2 = scmp.lt.s32.totalorder %s3166_s27, %s3166_s27 }
0x21d9   :  { %3148 = vtanh.f32 %v2266_v32  ;;  %v2267_v34 = vmul.f32 0.7978846, %v2265_v33 }
0x21da   :  { %p3173_p3 = por %p3172_p2, %p3171_p1 }
0x21db   :  { %3150 = vtanh.f32 %v2267_v34 }
0x21dc   :  { %p3174_p4 = pnand %p3173_p3, %p3167_p0 }
0x21e3   :  { %v3149_v35 = vpop.eup %3148 }
0x21e4   :  { %v2270_v36 = vadd.f32 1.0, %v3149_v35 }
0x21e5   :  { %v3151_v37 = vpop.eup %3150 }
0x21e6   :  { %v2271_v40 = vadd.f32 1.0, %v3151_v37  ;;  %v2272_v41 = vmul.f32 %v2270_v36, %v2256_v38 }
0x21e8   :  { %v2273_v63 = vmul.f32 %v2271_v40, %v2257_v39 }
0x21ea   :  { %v2290_v4 = vpack.c.bf16 %v2273_v63, %v2272_v41 }
0x21ec   :  { %2960 = vmatmul.mubr.bf16.vlgmr.msra.gmra.mrb[56].mxu0 %v2290_v4 }
0x22bf   :  { %v2380_v8 = vpop.f32.mrb[56].mxu0 }
0x22c0   :  { %v2381_v43 = vadd.f32 %v2619_v42, %v2380_v8  ;;  %v2961_v44 = vpop.f32.mrb[57].mxu0 }
0x22c1   :  { %v2383_v45 = vpop.f32.mrb[58].mxu0 }
0x22c2   :  { %v2384_v26 = vadd.f32 %v2619_v42, %v2383_v45  ;;  %v2962_v29 = vpop.f32.mrb[59].mxu0  ;;  %v2389_v47 = vsel %vm256_vm4, %v2381_v43, 0.0 }
0x22c3   :  { %2390 = vadd.xlane.f32.xlu1 %v2389_v47 }
0x22c4   :  { %v2392_v48 = vsel %vm256_vm4, %v2384_v26, 0.0 }
0x22c5   :  { %2393 = vadd.xlane.f32.xlu0 %v2392_v48 }
0x2350   :  { %v2391_v59 = vpop.xlane.xlu1 %2390 }
0x2351   :  { %v2395_v60 = vmul.f32 0.03125, %v2391_v59 }
0x2352   :  { %v2394_v61 = vpop.xlane.xlu0 %2393 }
0x2353   :  { %v2397_v62 = vsub.f32 %v2381_v43, %v2395_v60  ;;  %v2396_v0 = vmul.f32 0.03125, %v2394_v61 }
0x2355   :  { %v2398_v1 = vsub.f32 %v2384_v26, %v2396_v0  ;;  %v2399_v3 = vmul.f32 %v2397_v62, %v2397_v62 }
0x2357   :  { %v2401_v5 = vsel %vm256_vm4, %v2399_v3, 0.0  ;;  %v2400_v6 = vmul.f32 %v2398_v1, %v2398_v1 }
0x2358   :  { %2402 = vadd.xlane.f32.xlu0 %v2401_v5 }
0x2359   :  { %v2404_v9 = vsel %vm256_vm4, %v2400_v6, 0.0 }
0x235c   :  { %2405 = vadd.xlane.f32.xlu0 %v2404_v9 }
0x23e5   :  { %v2403_v16 = vpop.xlane.xlu0 %2402 }
0x23e6   :  { %v2407_v17 = vmul.f32 0.03125, %v2403_v16 }
0x23e8   :  { %v2409_v18 = vadd.f32 1e-05, %v2407_v17 }
0x23e9   :  { %v2406_v19 = vpop.xlane.xlu0 %2405 }
0x23ea   :  { %3152 = vrsqrt.f32 %v2409_v18  ;;  %v2408_v20 = vmul.f32 0.03125, %v2406_v19 }
0x23ec   :  { %v2410_v21 = vadd.f32 1e-05, %v2408_v20 }
0x23ee   :  { %3154 = vrsqrt.f32 %v2410_v21 }
0x23f4   :  { %v3153_v22 = vpop.eup %3152 }
0x23f5   :  { %v2413_v23 = vmul.f32 %v3153_v22, %v2397_v62 }
0x23f7   :  { %v2421_v27 = vmul.f32 %v2628_v24, %v2413_v23 }
0x23f8   :  { %v3155_v25 = vpop.eup %3154 }
0x23f9   :  { %v2414_v28 = vmul.f32 %v3155_v25, %v2398_v1  ;;  %v2429_v30 = vadd.f32 %v2629_v2, %v2421_v27 }
0x23fb   :  { %v2422_v7 = vmul.f32 %v2628_v24, %v2414_v28 }
0x23fd   :  { %v2430_v31 = vadd.f32 %v2629_v2, %v2422_v7 }
0x23ff   :  { %v2431_v11 = vpack.c.bf16 %v2430_v31, %v2429_v30 }
0x2401   :  { %2980 = vmatmul.mubr.msk.bf16.vlgmr.msra.gmra.mrb[64].mxu1 %vm256_vm4, %v2431_v11 }
0x24d4   :  { %v2493_v32 = vpop.f32.mrb[64].mxu1 }
0x24d5   :  { %2500 = vst [vmem:[#allocation2] sm:$0xff] %v2493_v32  ;;  %v2981_v33 = vpop.f32.mrb[65].mxu1 }
0x24d6   :  { %v2496_v34 = vpop.f32.mrb[66].mxu1 }
0x24d7   :  { %2501 = vst [vmem:[#allocation2 + $0x8] sm:$0xff] %v2496_v34  ;;  %v2982_v35 = vpop.f32.mrb[67].mxu1 }
0x24d8   :  { %3177 = shalt.err (!%p3174_p4)
}
0x24d9   :  { %s3178_s4 = scalar_lea.hbm %s3396_s6, 256 }
0x24da   :  { %p3179_p5 = scmp.ne.s32.totalorder %s3396_s6, %s3178_s4  ;;  %p3182_p6 = scmp.lt.u32.totalorder %s3178_s4, %s3396_s6 }
0x24dc   :  { %p3184_p7 = pnand %p3182_p6, %p3179_p5 }
0x24de   :  { %3187 = shalt.err (!%p3184_p7)
}
0x24df   :  { %s3236_s10 = smov 128   ;;  %s3237_s11 = smov 8  }
0x24e0   :  { %2513 = dma.vmem_to_hbm [thread:$0]  %s2508_s20, 256, %s3396_s6, [#allocation3], %s3236_s10, %s3236_s10, %s3237_s11  }
0x24e1   :  { %3188 = dma.done.wait [#allocation3], 256  }
0x24e2   :  { %3189 = vsyncadd [#allocation3], 4294967040 }
0x24e3   :  { %2517 = vsyncpa [#allocation3], 1 }

</bundles_post_ra>
